<compile_context>
chip_gen: v7x
topology: tpu7x:2x2x1
jax: 0.10.0
libtpu: 0.0.40
codegen_flags: <defaults>
</compile_context>

<pallas_src>
import functools
import numpy as np
import jax
import jax.numpy as jnp
from jax import lax
from jax.experimental import pallas as pl
from jax.experimental.pallas import tpu as pltpu


# ----------------------------- in-kernel helpers -----------------------------

_SQRT_2_OVER_PI = 0.7978845608028654


def _gelu_tanh(x):
    # tanh-approximate GELU: the tanh executes on the EUP slot (otherwise idle while
    # VPU/MXU are busy); |err| vs exact erf-GELU < 1e-3, far inside the test tolerance.
    return 0.5 * x * (1.0 + jnp.tanh(_SQRT_2_OVER_PI * (x + 0.044715 * x * x * x)))


def _shift_lanes(x, off, n):
    """y[:, p] = x[:, (p + off) mod n]  (cyclic; wrapped lanes are masked by caller).

    Written as a static two-slice concat along the lane axis so the shift stays in
    registers (equivalent to jnp.roll(x, -off, axis=-1)); no padded VMEM buffer and
    no re-load of the activation."""
    s = (-off) % n
    if s == 0:
        return x
    return jnp.concatenate([x[:, n - s:], x[:, :n - s]], axis=1)


# --------------------------------- kernel ------------------------------------

def _cglu_kernel(H, W,
                 x_ref, w1_ref, b1_ref, dwk_ref, dwb_ref, w2_ref, b2_ref, mask_ref,
                 o_ref):
    f32 = jnp.float32
    HW = H * W
    h = dwb_ref.shape[0]                         # hidden channels of the GLU

    x = x_ref[0]                                 # (C, HW) f32, lane-dense in HW
    xb = x.astype(jnp.bfloat16)

    # ---- fc1: one fused matmul (bf16 operands, f32 accumulation) ----
    u = jnp.dot(w1_ref[...], xb, preferred_element_type=f32) + b1_ref[...]   # (2h, HW)
    g = u[:h, :]                                 # gate half  (sublane-aligned split)
    v = u[h:, :]                                 # value half

    # ---- 3x3 depthwise conv (stride 1, zero pad 1) on the gate half ----
    # 9 shifted multiply-accumulates along the flattened HW lane axis, fully in
    # registers; out-of-image taps are zeroed by precomputed masks.
    acc = g * dwk_ref[:, 4:5]                    # centre tap: no shift, no mask
    for t in range(9):
        if t == 4:
            continue
        oi, oj = t // 3 - 1, t % 3 - 1
        shifted = _shift_lanes(g, oi * W + oj, HW)
        acc = acc + (shifted * mask_ref[t:t + 1, :]) * dwk_ref[:, t:t + 1]
    d = acc + dwb_ref[...]                       # (h, HW)

    # ---- GLU gating + fc2 ----
    act = _gelu_tanh(d) * v                      # (h, HW)
    out = jnp.dot(w2_ref[...], act.astype(jnp.bfloat16),
                  preferred_element_type=f32) + b2_ref[...]                  # (Co, HW)
    o_ref[0] = out


# ------------------------- parameter / glue utilities ------------------------

def make_params(key, in_features, hidden_features=None, out_features=None):
    """Deterministic synthetic parameters in PyTorch (out, in) conventions."""
    hidden_features = hidden_features or in_features
    out_features = out_features or in_features
    h = int(2 * hidden_features / 3)             # matches the PyTorch module
    ks = jax.random.split(key, 6)

    def w(k, shape, scale):
        return (scale * jax.random.normal(k, shape)).astype(jnp.float32)

    return dict(
        fc1_w=w(ks[0], (2 * h, in_features), 0.2), fc1_b=w(ks[1], (2 * h,), 0.05),
        dw_w=w(ks[2], (h, 3, 3), 0.2),             dw_b=w(ks[3], (h,), 0.05),
        fc2_w=w(ks[4], (out_features, h), 0.2),    fc2_b=w(ks[5], (out_features,), 0.05),
    )


def _tap_masks(H, W):
    """(9, H*W) f32 masks: mask[t, p]=1 iff tap t of the 3x3 conv is inside the image."""
    m = np.zeros((9, H, W), np.float32)
    for t in range(9):
        oi, oj = t // 3 - 1, t % 3 - 1
        m[t, max(0, -oi):H - max(0, oi), max(0, -oj):W - max(0, oj)] = 1.0
    return m.reshape(9, H * W)


def _prepare_kernel_params(p, H, W):
    h = int(p['dw_b'].shape[0])
    return [
        p['fc1_w'].astype(jnp.bfloat16),                  # (2h, C)  bf16 for the MXU
        p['fc1_b'][:, None].astype(jnp.float32),          # (2h, 1)
        p['dw_w'].reshape(h, 9).astype(jnp.float32),      # (h, 9)   per-channel taps
        p['dw_b'][:, None].astype(jnp.float32),           # (h, 1)
        p['fc2_w'].astype(jnp.bfloat16),                  # (Co, h)  bf16 for the MXU
        p['fc2_b'][:, None].astype(jnp.float32),          # (Co, 1)
        jnp.asarray(_tap_masks(H, W), jnp.float32),       # (9, HW)  boundary masks
    ]


def conv_glu_pallas(x, H, W, p):
    """x: (B, N, C) with N == H*W.  Returns (B, N, out_features)."""
    B, N, C = x.shape
    assert N == H * W
    HW = N
    h = int(p['dw_b'].shape[0])
    c_out = int(p['fc2_b'].shape[0])

    x_cf = jnp.transpose(x, (0, 2, 1))                    # (B, C, HW) channels-first
    plist = _prepare_kernel_params(p, H, W)

    def const_spec(a):
        nd = a.ndim
        return pl.BlockSpec(a.shape, lambda b, _nd=nd: (0,) * _nd)

    flops = B * (2 * HW * C * 2 * h            # fc1
                 + 2 * HW * h * c_out          # fc2
                 + HW * h * (9 * 3 + 12))      # dwconv + GLU elementwise (approx)
    bytes_accessed = (x_cf.size * 4 + B * c_out * HW * 4
                      + sum(int(a.size) * a.dtype.itemsize for a in plist))
    cost = pl.CostEstimate(flops=int(flops),
                           transcendentals=int(B * HW * h),
                           bytes_accessed=int(bytes_accessed))

    kernel = functools.partial(_cglu_kernel, H, W)
    out_cf = pl.pallas_call(
        kernel,
        out_shape=jax.ShapeDtypeStruct((B, c_out, HW), jnp.float32),
        grid=(B,),
        in_specs=[pl.BlockSpec((1, C, HW), lambda b: (b, 0, 0))]
                 + [const_spec(a) for a in plist],
        out_specs=pl.BlockSpec((1, c_out, HW), lambda b: (b, 0, 0)),
        compiler_params=pltpu.CompilerParams(dimension_semantics=("parallel",)),
        cost_estimate=cost,
    )(x_cf, *plist)
    return jnp.transpose(out_cf, (0, 2, 1))               # (B, N, Co)


# ------------------------- pure-JAX reference (exact) ------------------------

def conv_glu_reference(x, H, W, p):
    hp = lax.Precision.HIGHEST
    B, N, C = x.shape
    h = int(p['dw_b'].shape[0])

    u = jnp.einsum('bnc,oc->bno', x, p['fc1_w'], precision=hp) + p['fc1_b']
    g, v = u[..., :h], u[..., h:]

    g_img = jnp.transpose(g, (0, 2, 1)).reshape(B, h, H, W)
    d = lax.conv_general_dilated(
        g_img, p['dw_w'][:, None, :, :], window_strides=(1, 1),
        padding=((1, 1), (1, 1)), dimension_numbers=('NCHW', 'OIHW', 'NCHW'),
        feature_group_count=h, precision=hp) + p['dw_b'][None, :, None, None]
    d = jnp.transpose(d.reshape(B, h, N), (0, 2, 1))

    gelu_d = 0.5 * d * (1.0 + lax.erf(d * 0.7071067811865476))   # exact (torch default)
    act = gelu_d * v
    return jnp.einsum('bnh,oh->bno', act, p['fc2_w'], precision=hp) + p['fc2_b']


# ----------------------------------- main -------------------------------------

if __name__ == "__main__":
    B, C, H, W = 2, 4, 16, 16
    hidden_features = 48                 # -> hidden = int(2*48/3) = 32
    N = H * W

    key = jax.random.PRNGKey(0)
    kx, kp = jax.random.split(key)
    x = jax.random.normal(kx, (B, N, C), jnp.float32)
    params = make_params(kp, in_features=C, hidden_features=hidden_features)

    out = jax.block_until_ready(conv_glu_pallas(x, H, W, params))
    ref = jax.block_until_ready(conv_glu_reference(x, H, W, params))

    assert out.shape == (B, N, C)
    err = float(jnp.max(jnp.abs(out - ref)))
    if not np.isfinite(err) or err > 5e-2:
        raise AssertionError(f"Pallas kernel mismatch vs reference, max abs err={err}")
    print("KERNEL_OK")
</pallas_src>

<mosaic_0001>
module attributes {stable_mosaic.version = 11 : i64} {
  func.func @_cglu_kernel(%arg0: i32, %arg1: memref<1x4x256xf32, #tpu.memory_space<vmem>>, %arg2: memref<64x4xbf16, #tpu.memory_space<vmem>>, %arg3: memref<64x1xf32, #tpu.memory_space<vmem>>, %arg4: memref<32x9xf32, #tpu.memory_space<vmem>>, %arg5: memref<32x1xf32, #tpu.memory_space<vmem>>, %arg6: memref<4x32xbf16, #tpu.memory_space<vmem>>, %arg7: memref<4x1xf32, #tpu.memory_space<vmem>>, %arg8: memref<9x256xf32, #tpu.memory_space<vmem>>, %arg9: memref<1x4x256xf32, #tpu.memory_space<vmem>>) attributes {dimension_semantics = [#tpu.dimension_semantics<parallel>], iteration_bounds = array<i64: 2>, scalar_prefetch = 0 : i64, scratch_operands = 0 : i64, tpu.core_type = #tpu.core_type<tc>, window_params = [{transform_indices = @transform_0, window_bounds = array<i64: 1, 4, 256>}, {pipeline_mode = #tpu.pipeline_mode<synchronous>, transform_indices = @transform_1, window_bounds = array<i64: 64, 4>}, {pipeline_mode = #tpu.pipeline_mode<synchronous>, transform_indices = @transform_2, window_bounds = array<i64: 64, 1>}, {pipeline_mode = #tpu.pipeline_mode<synchronous>, transform_indices = @transform_3, window_bounds = array<i64: 32, 9>}, {pipeline_mode = #tpu.pipeline_mode<synchronous>, transform_indices = @transform_4, window_bounds = array<i64: 32, 1>}, {pipeline_mode = #tpu.pipeline_mode<synchronous>, transform_indices = @transform_5, window_bounds = array<i64: 4, 32>}, {pipeline_mode = #tpu.pipeline_mode<synchronous>, transform_indices = @transform_6, window_bounds = array<i64: 4, 1>}, {pipeline_mode = #tpu.pipeline_mode<synchronous>, transform_indices = @transform_7, window_bounds = array<i64: 9, 256>}, {transform_indices = @transform_8, window_bounds = array<i64: 1, 4, 256>}]} {
    %c0 = arith.constant 0 : index
    %c0_0 = arith.constant 0 : index
    %c0_1 = arith.constant 0 : index
    %0 = vector.load %arg1[%c0, %c0_0, %c0_1] : memref<1x4x256xf32, #tpu.memory_space<vmem>>, vector<1x4x256xf32>
    %1 = vector.shape_cast %0 : vector<1x4x256xf32> to vector<4x256xf32>
    %2 = arith.truncf %1 : vector<4x256xf32> to vector<4x256xbf16>
    %c0_2 = arith.constant 0 : index
    %c0_3 = arith.constant 0 : index
    %3 = vector.load %arg2[%c0_2, %c0_3] : memref<64x4xbf16, #tpu.memory_space<vmem>>, vector<64x4xbf16>
    %cst = arith.constant dense<0.000000e+00> : vector<64x256xf32>
    %4 = tpu.matmul %3, %2, %cst {dimension_numbers = #tpu.dot_dimension_numbers<[1], [0], [0], [1], [0, 0, 1, 1], [], []>} : vector<64x4xbf16>, vector<4x256xbf16>, vector<64x256xf32> -> vector<64x256xf32>
    %c0_4 = arith.constant 0 : index
    %c0_5 = arith.constant 0 : index
    %5 = vector.load %arg3[%c0_4, %c0_5] : memref<64x1xf32, #tpu.memory_space<vmem>>, vector<64x1xf32>
    %6 = vector.broadcast %5 : vector<64x1xf32> to vector<64x256xf32>
    %7 = arith.addf %4, %6 : vector<64x256xf32>
    %8 = vector.extract_strided_slice %7 {offsets = [0, 0], sizes = [32, 256], strides = [1, 1]} : vector<64x256xf32> to vector<32x256xf32>
    %9 = vector.extract_strided_slice %7 {offsets = [32, 0], sizes = [32, 256], strides = [1, 1]} : vector<64x256xf32> to vector<32x256xf32>
    %c0_6 = arith.constant 0 : index
    %c4 = arith.constant 4 : index
    %10 = vector.load %arg4[%c0_6, %c4] : memref<32x9xf32, #tpu.memory_space<vmem>>, vector<32x1xf32>
    %11 = vector.broadcast %10 : vector<32x1xf32> to vector<32x256xf32>
    %12 = arith.mulf %8, %11 : vector<32x256xf32>
    %13 = vector.extract_strided_slice %8 {offsets = [0, 239], sizes = [32, 17], strides = [1, 1]} : vector<32x256xf32> to vector<32x17xf32>
    %14 = vector.extract_strided_slice %8 {offsets = [0, 0], sizes = [32, 239], strides = [1, 1]} : vector<32x256xf32> to vector<32x239xf32>
    %15 = tpu.concatenate %13, %14 in 1 : vector<32x17xf32>, vector<32x239xf32> -> vector<32x256xf32>
    %c0_7 = arith.constant 0 : index
    %c0_8 = arith.constant 0 : index
    %16 = vector.load %arg8[%c0_7, %c0_8] : memref<9x256xf32, #tpu.memory_space<vmem>>, vector<1x256xf32>
    %17 = vector.broadcast %16 : vector<1x256xf32> to vector<32x256xf32>
    %18 = arith.mulf %15, %17 : vector<32x256xf32>
    %c0_9 = arith.constant 0 : index
    %c0_10 = arith.constant 0 : index
    %19 = vector.load %arg4[%c0_9, %c0_10] : memref<32x9xf32, #tpu.memory_space<vmem>>, vector<32x1xf32>
    %20 = vector.broadcast %19 : vector<32x1xf32> to vector<32x256xf32>
    %21 = arith.mulf %18, %20 : vector<32x256xf32>
    %22 = arith.addf %12, %21 : vector<32x256xf32>
    %23 = vector.extract_strided_slice %8 {offsets = [0, 240], sizes = [32, 16], strides = [1, 1]} : vector<32x256xf32> to vector<32x16xf32>
    %24 = vector.extract_strided_slice %8 {offsets = [0, 0], sizes = [32, 240], strides = [1, 1]} : vector<32x256xf32> to vector<32x240xf32>
    %25 = tpu.concatenate %23, %24 in 1 : vector<32x16xf32>, vector<32x240xf32> -> vector<32x256xf32>
    %c1 = arith.constant 1 : index
    %c0_11 = arith.constant 0 : index
    %26 = vector.load %arg8[%c1, %c0_11] : memref<9x256xf32, #tpu.memory_space<vmem>>, vector<1x256xf32>
    %27 = vector.broadcast %26 : vector<1x256xf32> to vector<32x256xf32>
    %28 = arith.mulf %25, %27 : vector<32x256xf32>
    %c0_12 = arith.constant 0 : index
    %c1_13 = arith.constant 1 : index
    %29 = vector.load %arg4[%c0_12, %c1_13] : memref<32x9xf32, #tpu.memory_space<vmem>>, vector<32x1xf32>
    %30 = vector.broadcast %29 : vector<32x1xf32> to vector<32x256xf32>
    %31 = arith.mulf %28, %30 : vector<32x256xf32>
    %32 = arith.addf %22, %31 : vector<32x256xf32>
    %33 = vector.extract_strided_slice %8 {offsets = [0, 241], sizes = [32, 15], strides = [1, 1]} : vector<32x256xf32> to vector<32x15xf32>
    %34 = vector.extract_strided_slice %8 {offsets = [0, 0], sizes = [32, 241], strides = [1, 1]} : vector<32x256xf32> to vector<32x241xf32>
    %35 = tpu.concatenate %33, %34 in 1 : vector<32x15xf32>, vector<32x241xf32> -> vector<32x256xf32>
    %c2 = arith.constant 2 : index
    %c0_14 = arith.constant 0 : index
    %36 = vector.load %arg8[%c2, %c0_14] : memref<9x256xf32, #tpu.memory_space<vmem>>, vector<1x256xf32>
    %37 = vector.broadcast %36 : vector<1x256xf32> to vector<32x256xf32>
    %38 = arith.mulf %35, %37 : vector<32x256xf32>
    %c0_15 = arith.constant 0 : index
    %c2_16 = arith.constant 2 : index
    %39 = vector.load %arg4[%c0_15, %c2_16] : memref<32x9xf32, #tpu.memory_space<vmem>>, vector<32x1xf32>
    %40 = vector.broadcast %39 : vector<32x1xf32> to vector<32x256xf32>
    %41 = arith.mulf %38, %40 : vector<32x256xf32>
    %42 = arith.addf %32, %41 : vector<32x256xf32>
    %43 = vector.extract_strided_slice %8 {offsets = [0, 255], sizes = [32, 1], strides = [1, 1]} : vector<32x256xf32> to vector<32x1xf32>
    %44 = vector.extract_strided_slice %8 {offsets = [0, 0], sizes = [32, 255], strides = [1, 1]} : vector<32x256xf32> to vector<32x255xf32>
    %45 = tpu.concatenate %43, %44 in 1 : vector<32x1xf32>, vector<32x255xf32> -> vector<32x256xf32>
    %c3 = arith.constant 3 : index
    %c0_17 = arith.constant 0 : index
    %46 = vector.load %arg8[%c3, %c0_17] : memref<9x256xf32, #tpu.memory_space<vmem>>, vector<1x256xf32>
    %47 = vector.broadcast %46 : vector<1x256xf32> to vector<32x256xf32>
    %48 = arith.mulf %45, %47 : vector<32x256xf32>
    %c0_18 = arith.constant 0 : index
    %c3_19 = arith.constant 3 : index
    %49 = vector.load %arg4[%c0_18, %c3_19] : memref<32x9xf32, #tpu.memory_space<vmem>>, vector<32x1xf32>
    %50 = vector.broadcast %49 : vector<32x1xf32> to vector<32x256xf32>
    %51 = arith.mulf %48, %50 : vector<32x256xf32>
    %52 = arith.addf %42, %51 : vector<32x256xf32>
    %53 = vector.extract_strided_slice %8 {offsets = [0, 1], sizes = [32, 255], strides = [1, 1]} : vector<32x256xf32> to vector<32x255xf32>
    %54 = vector.extract_strided_slice %8 {offsets = [0, 0], sizes = [32, 1], strides = [1, 1]} : vector<32x256xf32> to vector<32x1xf32>
    %55 = tpu.concatenate %53, %54 in 1 : vector<32x255xf32>, vector<32x1xf32> -> vector<32x256xf32>
    %c5 = arith.constant 5 : index
    %c0_20 = arith.constant 0 : index
    %56 = vector.load %arg8[%c5, %c0_20] : memref<9x256xf32, #tpu.memory_space<vmem>>, vector<1x256xf32>
    %57 = vector.broadcast %56 : vector<1x256xf32> to vector<32x256xf32>
    %58 = arith.mulf %55, %57 : vector<32x256xf32>
    %c0_21 = arith.constant 0 : index
    %c5_22 = arith.constant 5 : index
    %59 = vector.load %arg4[%c0_21, %c5_22] : memref<32x9xf32, #tpu.memory_space<vmem>>, vector<32x1xf32>
    %60 = vector.broadcast %59 : vector<32x1xf32> to vector<32x256xf32>
    %61 = arith.mulf %58, %60 : vector<32x256xf32>
    %62 = arith.addf %52, %61 : vector<32x256xf32>
    %63 = vector.extract_strided_slice %8 {offsets = [0, 15], sizes = [32, 241], strides = [1, 1]} : vector<32x256xf32> to vector<32x241xf32>
    %64 = vector.extract_strided_slice %8 {offsets = [0, 0], sizes = [32, 15], strides = [1, 1]} : vector<32x256xf32> to vector<32x15xf32>
    %65 = tpu.concatenate %63, %64 in 1 : vector<32x241xf32>, vector<32x15xf32> -> vector<32x256xf32>
    %c6 = arith.constant 6 : index
    %c0_23 = arith.constant 0 : index
    %66 = vector.load %arg8[%c6, %c0_23] : memref<9x256xf32, #tpu.memory_space<vmem>>, vector<1x256xf32>
    %67 = vector.broadcast %66 : vector<1x256xf32> to vector<32x256xf32>
    %68 = arith.mulf %65, %67 : vector<32x256xf32>
    %c0_24 = arith.constant 0 : index
    %c6_25 = arith.constant 6 : index
    %69 = vector.load %arg4[%c0_24, %c6_25] : memref<32x9xf32, #tpu.memory_space<vmem>>, vector<32x1xf32>
    %70 = vector.broadcast %69 : vector<32x1xf32> to vector<32x256xf32>
    %71 = arith.mulf %68, %70 : vector<32x256xf32>
    %72 = arith.addf %62, %71 : vector<32x256xf32>
    %73 = vector.extract_strided_slice %8 {offsets = [0, 16], sizes = [32, 240], strides = [1, 1]} : vector<32x256xf32> to vector<32x240xf32>
    %74 = vector.extract_strided_slice %8 {offsets = [0, 0], sizes = [32, 16], strides = [1, 1]} : vector<32x256xf32> to vector<32x16xf32>
    %75 = tpu.concatenate %73, %74 in 1 : vector<32x240xf32>, vector<32x16xf32> -> vector<32x256xf32>
    %c7 = arith.constant 7 : index
    %c0_26 = arith.constant 0 : index
    %76 = vector.load %arg8[%c7, %c0_26] : memref<9x256xf32, #tpu.memory_space<vmem>>, vector<1x256xf32>
    %77 = vector.broadcast %76 : vector<1x256xf32> to vector<32x256xf32>
    %78 = arith.mulf %75, %77 : vector<32x256xf32>
    %c0_27 = arith.constant 0 : index
    %c7_28 = arith.constant 7 : index
    %79 = vector.load %arg4[%c0_27, %c7_28] : memref<32x9xf32, #tpu.memory_space<vmem>>, vector<32x1xf32>
    %80 = vector.broadcast %79 : vector<32x1xf32> to vector<32x256xf32>
    %81 = arith.mulf %78, %80 : vector<32x256xf32>
    %82 = arith.addf %72, %81 : vector<32x256xf32>
    %83 = vector.extract_strided_slice %8 {offsets = [0, 17], sizes = [32, 239], strides = [1, 1]} : vector<32x256xf32> to vector<32x239xf32>
    %84 = vector.extract_strided_slice %8 {offsets = [0, 0], sizes = [32, 17], strides = [1, 1]} : vector<32x256xf32> to vector<32x17xf32>
    %85 = tpu.concatenate %83, %84 in 1 : vector<32x239xf32>, vector<32x17xf32> -> vector<32x256xf32>
    %c8 = arith.constant 8 : index
    %c0_29 = arith.constant 0 : index
    %86 = vector.load %arg8[%c8, %c0_29] : memref<9x256xf32, #tpu.memory_space<vmem>>, vector<1x256xf32>
    %87 = vector.broadcast %86 : vector<1x256xf32> to vector<32x256xf32>
    %88 = arith.mulf %85, %87 : vector<32x256xf32>
    %c0_30 = arith.constant 0 : index
    %c8_31 = arith.constant 8 : index
    %89 = vector.load %arg4[%c0_30, %c8_31] : memref<32x9xf32, #tpu.memory_space<vmem>>, vector<32x1xf32>
    %90 = vector.broadcast %89 : vector<32x1xf32> to vector<32x256xf32>
    %91 = arith.mulf %88, %90 : vector<32x256xf32>
    %92 = arith.addf %82, %91 : vector<32x256xf32>
    %c0_32 = arith.constant 0 : index
    %c0_33 = arith.constant 0 : index
    %93 = vector.load %arg5[%c0_32, %c0_33] : memref<32x1xf32, #tpu.memory_space<vmem>>, vector<32x1xf32>
    %94 = vector.broadcast %93 : vector<32x1xf32> to vector<32x256xf32>
    %95 = arith.addf %92, %94 : vector<32x256xf32>
    %cst_34 = arith.constant 5.000000e-01 : f32
    %96 = vector.broadcast %cst_34 : f32 to vector<32x256xf32>
    %97 = arith.mulf %96, %95 : vector<32x256xf32>
    %cst_35 = arith.constant 4.471500e-02 : f32
    %98 = vector.broadcast %cst_35 : f32 to vector<32x256xf32>
    %99 = arith.mulf %98, %95 : vector<32x256xf32>
    %100 = arith.mulf %99, %95 : vector<32x256xf32>
    %101 = arith.mulf %100, %95 : vector<32x256xf32>
    %102 = arith.addf %95, %101 : vector<32x256xf32>
    %cst_36 = arith.constant 0.797884583 : f32
    %103 = vector.broadcast %cst_36 : f32 to vector<32x256xf32>
    %104 = arith.mulf %103, %102 : vector<32x256xf32>
    %105 = math.tanh %104 : vector<32x256xf32>
    %cst_37 = arith.constant 1.000000e+00 : f32
    %106 = vector.broadcast %cst_37 : f32 to vector<32x256xf32>
    %107 = arith.addf %106, %105 : vector<32x256xf32>
    %108 = arith.mulf %97, %107 : vector<32x256xf32>
    %109 = arith.mulf %108, %9 : vector<32x256xf32>
    %c0_38 = arith.constant 0 : index
    %c0_39 = arith.constant 0 : index
    %110 = vector.load %arg6[%c0_38, %c0_39] : memref<4x32xbf16, #tpu.memory_space<vmem>>, vector<4x32xbf16>
    %111 = arith.truncf %109 : vector<32x256xf32> to vector<32x256xbf16>
    %cst_40 = arith.constant dense<0.000000e+00> : vector<4x256xf32>
    %112 = tpu.matmul %110, %111, %cst_40 {dimension_numbers = #tpu.dot_dimension_numbers<[1], [0], [0], [1], [0, 0, 1, 1], [], []>} : vector<4x32xbf16>, vector<32x256xbf16>, vector<4x256xf32> -> vector<4x256xf32>
    %c0_41 = arith.constant 0 : index
    %c0_42 = arith.constant 0 : index
    %113 = vector.load %arg7[%c0_41, %c0_42] : memref<4x1xf32, #tpu.memory_space<vmem>>, vector<4x1xf32>
    %114 = vector.broadcast %113 : vector<4x1xf32> to vector<4x256xf32>
    %115 = arith.addf %112, %114 : vector<4x256xf32>
    %c0_43 = arith.constant 0 : index
    %c0_44 = arith.constant 0 : index
    %c0_45 = arith.constant 0 : index
    %116 = vector.load %arg9[%c0_43, %c0_44, %c0_45] : memref<1x4x256xf32, #tpu.memory_space<vmem>>, vector<1x4x256xf32>
    %117 = vector.shape_cast %116 : vector<1x4x256xf32> to vector<4x256xf32>
    %118 = vector.shape_cast %115 : vector<4x256xf32> to vector<1x4x256xf32>
    tpu.vector_store %arg9[%c0_43, %c0_44, %c0_45], %118 {strides = array<i32>} : memref<1x4x256xf32, #tpu.memory_space<vmem>>, vector<1x4x256xf32>,
    return
  }
  func.func @transform_0(%arg0: i32) -> (i32, i32, i32) {
    %c0_i32 = arith.constant 0 : i32
    %c0_i32_0 = arith.constant 0 : i32
    %c0_i32_1 = arith.constant 0 : i32
    return %arg0, %c0_i32, %c0_i32_0 : i32, i32, i32
  }
  func.func @transform_1(%arg0: i32) -> (i32, i32) {
    %c0_i32 = arith.constant 0 : i32
    %c0_i32_0 = arith.constant 0 : i32
    %c0_i32_1 = arith.constant 0 : i32
    return %c0_i32, %c0_i32_0 : i32, i32
  }
  func.func @transform_2(%arg0: i32) -> (i32, i32) {
    %c0_i32 = arith.constant 0 : i32
    %c0_i32_0 = arith.constant 0 : i32
    %c0_i32_1 = arith.constant 0 : i32
    return %c0_i32, %c0_i32_0 : i32, i32
  }
  func.func @transform_3(%arg0: i32) -> (i32, i32) {
    %c0_i32 = arith.constant 0 : i32
    %c0_i32_0 = arith.constant 0 : i32
    %c0_i32_1 = arith.constant 0 : i32
    return %c0_i32, %c0_i32_0 : i32, i32
  }
  func.func @transform_4(%arg0: i32) -> (i32, i32) {
    %c0_i32 = arith.constant 0 : i32
    %c0_i32_0 = arith.constant 0 : i32
    %c0_i32_1 = arith.constant 0 : i32
    return %c0_i32, %c0_i32_0 : i32, i32
  }
  func.func @transform_5(%arg0: i32) -> (i32, i32) {
    %c0_i32 = arith.constant 0 : i32
    %c0_i32_0 = arith.constant 0 : i32
    %c0_i32_1 = arith.constant 0 : i32
    return %c0_i32, %c0_i32_0 : i32, i32
  }
  func.func @transform_6(%arg0: i32) -> (i32, i32) {
    %c0_i32 = arith.constant 0 : i32
    %c0_i32_0 = arith.constant 0 : i32
    %c0_i32_1 = arith.constant 0 : i32
    return %c0_i32, %c0_i32_0 : i32, i32
  }
  func.func @transform_7(%arg0: i32) -> (i32, i32) {
    %c0_i32 = arith.constant 0 : i32
    %c0_i32_0 = arith.constant 0 : i32
    %c0_i32_1 = arith.constant 0 : i32
    return %c0_i32, %c0_i32_0 : i32, i32
  }
  func.func @transform_8(%arg0: i32) -> (i32, i32, i32) {
    %c0_i32 = arith.constant 0 : i32
    %c0_i32_0 = arith.constant 0 : i32
    %c0_i32_1 = arith.constant 0 : i32
    return %arg0, %c0_i32, %c0_i32_0 : i32, i32, i32
  }
}

</mosaic_0001>

<bundles_post_ra>
// kernel: tpu_custom_call.1
= control target key start
LH: loop header
LB: loop body
LE: loop exit
PB: predicated region body
PF: predicated region fallthrough
CT: control target
= control target key end

     0   :  { %13 = vsyncpa [#allocation3], 0  ;;  %s2633_s0 = inlined_call_operand.vmem [shape: f32[2,4,256], index: 0, kind: input, shape index: {}]   ;;  %s2634_s1 = inlined_call_operand.vmem [shape: bf16[64,4], index: 1, kind: input, shape index: {}]   ;;  %s2635_s2 = inlined_call_operand.vmem [shape: f32[64,1], index: 2, kind: input, shape index: {}]   ;;  %s2636_s3 = inlined_call_operand.vmem [shape: f32[32,9], index: 3, kind: input, shape index: {}]   ;;  %s2637_s4 = inlined_call_operand.vmem [shape: f32[32,1], index: 4, kind: input, shape index: {}]   ;;  %s2638_s5 = inlined_call_operand.vmem [shape: bf16[4,32], index: 5, kind: input, shape index: {}]   ;;  %s2639_s6 = inlined_call_operand.vmem [shape: f32[4,1], index: 6, kind: input, shape index: {}]   ;;  %s2640_s7 = inlined_call_operand.vmem [shape: f32[9,256], index: 7, kind: input, shape index: {}]   ;;  %s2641_s8 = inlined_call_operand.hbm [shape: f32[2,4,256], index: 8, kind: output, shape index: {}]  }
   0x1   :  { %15 = vsyncpa [#allocation3 + $0x1], 0  ;;  %s1752_s27 = smov 0   ;;  %s1754_s28 = smov 0  }
   0x2   :  { %s1756_s29 = smov 0   ;;  %s1758_s30 = smov 0  }
   0x3 LB: > { %s1773_s9 = sadd.s32 4294967295, %s1687_s30   ;;  %s1486_s10 = sadd.s32 4294967294, %s1687_s30   ;;  %s1687_s30 = sphi %s1758_s30, %s2720_s30   ;;  %s1683_s29 = sphi %s1756_s29, %s2719_s29   ;;  %s1679_s28 = sphi %s1754_s28, %s2718_s28   ;;  %s1675_s27 = sphi %s1752_s27, %s2717_s27  }
   0x4   : > { %s1777_s11 = sadd.s32 1, %s1687_s30   ;;  %s201_s12 = sadd.s32 1, %s1683_s29 }
   0x5   : > { %s198_s13 = ssub.s32 %s1687_s30, %s1777_s11  ;;  %p211_p0 = scmp.ne.s32.totalorder %s1683_s29, %s1679_s28 }
   0x6   : > { %p199_p1 = scmp.eq.s32.totalorder %s198_s13, 0  ;;  %p212_p2 = scmp.eq.s32.totalorder %s1773_s9, 1 }
   0x7   : > { %p217_p3 = scmp.ne.s32.totalorder %s1679_s28, %s1675_s27  ;;  %p218_p4 = scmp.eq.s32.totalorder %s1486_s10, 1 }
   0x8   : > { %s1788_s14 = scalar_select %p199_p1, %s1683_s29, %s201_s12  }
   0x9   : > { %p1790_p5 = por %p212_p2, %p211_p0  ;;  %p1794_p6 = por %p218_p4, %p217_p3 }
   0xa   : > { %p1489_p7 = scmp.ge.s32.totalorder %s1687_s30, 1  ;;  %p265_p8 = scmp.lt.s32.totalorder %s1687_s30, 3 }
   0xc   : > { %p266_p9 = pnand %p1489_p7, %p265_p8 }
   0xe   : > { %269 = sbr.rel (%p266_p9) target bundleno = 793 (0x319), region = 52 }
  0x15   : > { %p299_p10 = scmp.lt.s32.totalorder %s1773_s9, 1  ;;  %v1689_v0 = vmov 0   ;;  %v1805_v1 = vld [vmem:[%s2636_s3] sm:$0xff]  ;;  %v1690_v2 = vmov 4   ;;  %v1814_v3 = vld [vmem:[%s2636_s3 + $0x10] sm:$0xff]  ;;  %v322_v5 = vld [vmem:[%s2635_s2 + $0x18] sm:$0xff] }
  0x16   : > { %439 = vmatprep.mubr.bf16.mxu0 %v1689_v0  ;;  %1575 = vset.pattern.permute.xlu1 %v1689_v0  ;;  %v321_v4 = vld [vmem:[%s2635_s2 + $0x10] sm:$0xff]  ;;  %vm400_vm0 = vcmask 1041408   ;;  %v1605_v11 = vld [vmem:[%s2634_s1] sm:$0xff]   ;;  %v1691_v12 = vmov 1   ;;  %vm387_vm1 = vcmask 31744   ;;  %v481_v13 = vld [vmem:[%s2636_s3 + $0x8] sm:$0xff] }
  0x17   : > { %s300_s19 = scalar_select %p299_p10, %s1773_s9, 1  ;;  %1576 = vset.pattern.permute.xlu0 %v1690_v2  ;;  %469 = vmatprep.mubr.bf16.mxu1 %v1689_v0  ;;  %v1692_v14 = vmov 2   ;;  %v1606_v15 = vld [vmem:[%s2634_s1 + $0x8] sm:$0xff]   ;;  %v1693_v16 = vmov 3   ;;  %v1694_v17 = vmov 5   ;;  %v483_v18 = vld [vmem:[%s2636_s3 + $0x18] sm:$0xff] }
  0x18   : > { %486 = vperm.xlu0 %1576, %v1805_v1   ;;  %339 = vperm.xlu1 %1575, %v321_v4   ;;  %v1695_v19 = vmov 6   ;;  %v1696_v20 = vmov 7   ;;  %v1697_v21 = vmov 8   ;;  %v319_v22 = vld [vmem:[%s2635_s2] sm:$0xff]  ;;  %v320_v23 = vld [vmem:[%s2635_s2 + $0x8] sm:$0xff]  ;;  %v1607_v26 = vld [vmem:[%s2634_s1 + $0x10] sm:$0xff]  }
  0x19   : > { %s1515_s20 = sshll.u32 %s300_s19, 3  ;;  %v1239_v24 = vld [vmem:[%s2637_s4] sm:$0xff]  ;;  %v1240_v25 = vld [vmem:[%s2637_s4 + $0x8] sm:$0xff]  ;;  %v1608_v27 = vld [vmem:[%s2634_s1 + $0x18] sm:$0xff]   ;;  %s1698_s24 = smov 16   ;;  %vm540_vm2 = vcmask 138240  }
  0x1a   : > { %s303_s10 = scalar_lea.vmem %s2633_s0, %s1515_s20  ;;  %s1699_s25 = smov 17   ;;  %vm895_vm3 = vcmask 1039360   ;;  %vm985_vm4 = vcmask 924672   ;;  %vm1075_vm5 = vcmask 916480   ;;  %vm629_vm6 = vcmask 130048  }
  0x1b   : > { %v305_v6 = vld [vmem:[%s303_s10] sm:$0xff]  ;;  %s1700_s26 = smov 15   ;;  %s1701_s10 = smov 111   ;;  %vm719_vm7 = vcmask 121856   ;;  %vm809_vm8 = vcmask 7168   ;;  %vm1165_vm9 = vcmask 908288  }
  0x1c   : > { %v307_v7 = vcombine.high %v305_v6, %v305_v6  ;;  %v309_v8 = vpack.c.bf16 %v305_v6, %v305_v6  ;;  %496 = vperm.xlu0 %1576, %v1814_v3   ;;  %344 = vperm.xlu1 %1575, %v322_v5   ;;  %s1702_s12 = smov 1   ;;  %s1703_s13 = smov 127   ;;  %vm1362_vm10 = vcmask 261120  }
  0x1d   : > { %s1704_s17 = smov 113   ;;  %s1705_s18 = smov 112  }
  0x1e   : > { %v310_v9 = vpack.c.bf16 %v307_v7, %v307_v7  ;;  %v402_v10 = vsel %vm400_vm0, %v309_v8, 0  ;;  %s296_s21 = sand.u32 1, %s1679_s28  }
  0x20   : > { %1497 = vmatprep.subr.msk.bf16.mxu0 %vm400_vm0, %v310_v9  ;;  %1583 = vset.pattern.permute.xlu0 %v1691_v12 }
  0x21   : > { %408 = vmatpush1.bf16.msra.mxu0 %v402_v10  ;;  %676 = vperm.xlu0 %1583, %v1814_v3  }
  0x22   : > { %1577 = vset.pattern.permute.xlu1 %v1690_v2  ;;  %1517 = vmatprep.subr.msk.bf16.mxu1 %vm400_vm0, %v310_v9 }
  0x23   : > { %491 = vperm.xlu1 %1577, %v481_v13   ;;  %1518 = vmatpush1.bf16.msra.mxu1 %v402_v10 }
  0x24   : > { %1498 = vmatmul.mubr.msk.bf16.vlgmr.msra.gmra.mrb[0].mxu0 %vm387_vm1, %v1605_v11 }
  0x25   : > { %449 = vmatprep.mubr.bf16.mxu0 %v1689_v0  ;;  %1586 = vset.pattern.permute.xlu0 %v1692_v14 }
  0x26   : > { %766 = vperm.xlu0 %1586, %v1814_v3   ;;  %1501 = vmatmul.mubr.msk.bf16.vlgmr.msra.gmra.mrb[0].mxu1 %vm387_vm1, %v1608_v27 }
  0x27   : > { %1578 = vset.pattern.permute.xlu1 %v1689_v0  ;;  %1398 = vmatprep.mubr.bf16.mxu1 %v1689_v0 }
  0x28   : > { %578 = vperm.xlu1 %1578, %v1805_v1  }
  0x2a   : > { %1587 = vset.pattern.permute.xlu0 %v1693_v16 }
  0x2b   : > { %852 = vperm.xlu0 %1587, %v481_v13  }
  0x2c   : > { %1499 = vmatmul.mubr.msk.bf16.gmra.mrb[4].mxu0 %vm387_vm1, %v1606_v15  ;;  %1579 = vset.pattern.permute.xlu1 %v1691_v12 }
  0x2d   : > { %668 = vperm.xlu1 %1579, %v1805_v1   ;;  %459 = vmatprep.mubr.bf16.mxu0 %v1689_v0 }
  0x2f   : > { %856 = vperm.xlu0 %1587, %v1814_v3  }
  0x31   : > { %672 = vperm.xlu1 %1579, %v481_v13  }
  0x33   : > { %1590 = vset.pattern.permute.xlu0 %v1694_v17 }
  0x34   : > { %942 = vperm.xlu0 %1590, %v481_v13   ;;  %1500 = vmatmul.mubr.msk.bf16.gmra.mrb[8].mxu0 %vm387_vm1, %v1607_v26 }
  0x35   : > { %1580 = vset.pattern.permute.xlu1 %v1690_v2 }
  0x36   : > { %501 = vperm.xlu1 %1580, %v483_v18  }
  0x38   : > { %946 = vperm.xlu0 %1590, %v1814_v3  }
  0x3a   : > { %1581 = vset.pattern.permute.xlu1 %v1689_v0 }
  0x3b   : > { %586 = vperm.xlu1 %1581, %v1814_v3  }
  0x3c   : > { %1593 = vset.pattern.permute.xlu0 %v1695_v19 }
  0x3d   : > { %1032 = vperm.xlu0 %1593, %v481_v13  }
  0x3f   : > { %1582 = vset.pattern.permute.xlu1 %v1692_v14 }
  0x40   : > { %758 = vperm.xlu1 %1582, %v1805_v1  }
  0x41   : > { %1036 = vperm.xlu0 %1593, %v1814_v3  }
  0x44   : > { %762 = vperm.xlu1 %1582, %v481_v13  }
  0x45   : > { %1596 = vset.pattern.permute.xlu0 %v1696_v20 }
  0x46   : > { %1122 = vperm.xlu0 %1596, %v481_v13  }
  0x48   : > { %1584 = vset.pattern.permute.xlu1 %v1691_v12 }
  0x49   : > { %680 = vperm.xlu1 %1584, %v483_v18  }
  0x4a   : > { %1126 = vperm.xlu0 %1596, %v1814_v3  }
  0x4d   : > { %1585 = vset.pattern.permute.xlu1 %v1693_v16 }
  0x4e   : > { %1599 = vset.pattern.permute.xlu0 %v1697_v21  ;;  %848 = vperm.xlu1 %1585, %v1805_v1  }
  0x4f   : > { %1212 = vperm.xlu0 %1599, %v481_v13  }
  0x52   : > { %1588 = vset.pattern.permute.xlu1 %v1692_v14 }
  0x53   : > { %1220 = vperm.xlu0 %1599, %v483_v18   ;;  %770 = vperm.xlu1 %1588, %v483_v18  }
  0x57   : > { %1602 = vset.pattern.permute.xlu0 %v1689_v0  ;;  %1589 = vset.pattern.permute.xlu1 %v1694_v17 }
  0x58   : > { %329 = vperm.xlu0 %1602, %v319_v22   ;;  %938 = vperm.xlu1 %1589, %v1805_v1   ;;  %v559_v22 = vlaneseq }
  0x5c   : > { %334 = vperm.xlu0 %1602, %v320_v23   ;;  %1591 = vset.pattern.permute.xlu1 %v1693_v16  ;;  %v324_v23 = vld [vmem:[%s2635_s2 + $0x28] sm:$0xff] }
  0x5d   : > { %860 = vperm.xlu1 %1591, %v483_v18  }
  0x60   : > { %582 = vperm.xlu0 %1602, %v481_v13  }
  0x61   : > { %1592 = vset.pattern.permute.xlu1 %v1695_v19 }
  0x62   : > { %1028 = vperm.xlu1 %1592, %v1805_v1  }
  0x64   : > { %590 = vperm.xlu0 %1602, %v483_v18  }
  0x66   : > { %1594 = vset.pattern.permute.xlu1 %v1694_v17 }
  0x67   : > { %950 = vperm.xlu1 %1594, %v483_v18  }
  0x6b   : > { %1595 = vset.pattern.permute.xlu1 %v1696_v20 }
  0x6c   : > { %1118 = vperm.xlu1 %1595, %v1805_v1  }
  0x70   : > { %1597 = vset.pattern.permute.xlu1 %v1695_v19 }
  0x71   : > { %1040 = vperm.xlu1 %1597, %v483_v18  }
  0x75   : > { %1598 = vset.pattern.permute.xlu1 %v1697_v21 }
  0x76   : > { %1208 = vperm.xlu1 %1598, %v1805_v1  }
  0x7a   : > { %1600 = vset.pattern.permute.xlu1 %v1696_v20  ;;  %v1241_v20 = vld [vmem:[%s2637_s4 + $0x10] sm:$0xff] }
  0x7b   : > { %1130 = vperm.xlu1 %1600, %v483_v18  }
  0x7f   : > { %1601 = vset.pattern.permute.xlu1 %v1697_v21 }
  0x80   : > { %1216 = vperm.xlu1 %1601, %v1814_v3  }
  0x84   : > { %1603 = vset.pattern.permute.xlu1 %v1689_v0 }
  0x85   : > { %1245 = vperm.xlu1 %1603, %v1239_v24  }
  0x89   : > { %1250 = vperm.xlu1 %1603, %v1240_v25  }
  0x97   : > { %v1886_v28 = vpop.permute.xlu0 %486  ;;  %v1908_v39 = vpop.permute.xlu1 %339 }
  0x9b   : > { %v1888_v29 = vpop.permute.xlu0 %496  ;;  %v1912_v41 = vpop.permute.xlu1 %344 }
  0xa0   : > { %v1890_v30 = vpop.permute.xlu0 %676 }
  0xa1   : > { %2663 = vst [vmem:[#allocation5_spill] sm:$0xff] %v1890_v30 }
  0xa2   : > { %v1916_v43 = vpop.permute.xlu1 %491 }
  0xa5   : > { %v1892_v31 = vpop.permute.xlu0 %766 }
  0xa6   : > { %2664 = vst [vmem:[#allocation6_spill] sm:$0xff] %v1892_v31 }
  0xa7   : > { %v1920_v45 = vpop.permute.xlu1 %578 }
  0xaa   : > { %v1894_v32 = vpop.permute.xlu0 %852 }
  0xac   : > { %v1924_v50 = vpop.permute.xlu1 %668 }
  0xae   : > { %v1896_v33 = vpop.permute.xlu0 %856 }
  0xaf   : > { %2665 = vst [vmem:[#allocation7_spill] sm:$0xff] %v1896_v33 }
  0xb0   : > { %v1934_v53 = vpop.permute.xlu1 %672 }
  0xb3   : > { %v1898_v34 = vpop.permute.xlu0 %942 }
  0xb5   : > { %v1946_v59 = vpop.permute.xlu1 %501 }
  0xb6   : > { %2670 = vst [vmem:[#allocation12_spill] sm:$0xff] %v1946_v59  ;;  %v1504_v59 = vld [vmem:[%s2640_s7 + $0x3] ss:$8 sm:$0x3] }
  0xb7   : > { %v1900_v35 = vpop.permute.xlu0 %946 }
  0xb8   : > { %2666 = vst [vmem:[#allocation8_spill] sm:$0xff] %v1900_v35 }
  0xba   : > { %v1952_v60 = vpop.permute.xlu1 %586 }
  0xbc   : > { %v1902_v36 = vpop.permute.xlu0 %1032 }
  0xbf   : > { %v1962_v61 = vpop.permute.xlu1 %758 }
  0xc0   : > { %v1904_v37 = vpop.permute.xlu0 %1036 }
  0xc1   : > { %2667 = vst [vmem:[#allocation9_spill] sm:$0xff] %v1904_v37 }
  0xc3   : > { %v1970_v0 = vpop.permute.xlu1 %762 }
  0xc5   : > { %v1906_v38 = vpop.permute.xlu0 %1122 }
  0xc8   : > { %v1976_v1 = vpop.permute.xlu1 %680 }
  0xc9   : > { %v1910_v40 = vpop.permute.xlu0 %1126  ;;  %2671 = vst [vmem:[#allocation13_spill] sm:$0xff] %v1976_v1 }
  0xca   : > { %2668 = vst [vmem:[#allocation10_spill] sm:$0xff] %v1910_v40 }
  0xcd   : > { %v1986_v2 = vpop.permute.xlu1 %848 }
  0xce   : > { %v1914_v42 = vpop.permute.xlu0 %1212 }
  0xd2   : > { %v1918_v44 = vpop.permute.xlu0 %1220  ;;  %v1994_v4 = vpop.permute.xlu1 %770 }
  0xd3   : > { %2669 = vst [vmem:[#allocation11_spill] sm:$0xff] %v1918_v44  ;;  %2672 = vst [vmem:[#allocation14_spill] sm:$0xff] %v1994_v4 }
  0xd7   : > { %v330_v46 = vpop.permute.xlu0 %329  ;;  %v2004_v5 = vpop.permute.xlu1 %938 }
  0xdb   : > { %v335_v62 = vpop.permute.xlu0 %334 }
  0xdc   : > { %v2010_v6 = vpop.permute.xlu1 %860 }
  0xdd   : > { %2673 = vst [vmem:[#allocation15_spill] sm:$0xff] %v2010_v6 }
  0xdf   : > { %v2090_v19 = vpop.permute.xlu0 %582 }
  0xe1   : > { %v2020_v7 = vpop.permute.xlu1 %1028 }
  0xe3   : > { %v2108_v25 = vpop.permute.xlu0 %590 }
  0xe4   : > { %2682 = vst [vmem:[#allocation24_spill] sm:$0xff] %v2108_v25 }
  0xe6   : > { %v2029_v9 = vpop.permute.xlu1 %950 }
  0xe7   : > { %2674 = vst [vmem:[#allocation16_spill] sm:$0xff] %v2029_v9 }
  0xeb   : > { %v2042_v11 = vpop.permute.xlu1 %1118 }
  0xf0   : > { %v2048_v12 = vpop.permute.xlu1 %1040 }
  0xf1   : > { %2675 = vst [vmem:[#allocation17_spill] sm:$0xff] %v2048_v12 }
  0xf5   : > { %v2058_v13 = vpop.permute.xlu1 %1208 }
  0xf7   : > { %v441_v47 = vpop.f32.mrb[0].mxu0 }
  0xf8   : > { %v1922_v48 = vadd.f32 %v441_v47, %v330_v46  ;;  %v443_v49 = vpop.f32.mrb[1].mxu0 }
  0xf9   : > { %v445_v51 = vpop.f32.mrb[2].mxu0  ;;  %v1936_v55 = vadd.f32 %v443_v49, %v330_v46  ;;  %v326_v46 = vld [vmem:[%s2635_s2 + $0x38] sm:$0xff] }
  0xfa   : > { %v447_v52 = vpop.f32.mrb[3].mxu0  ;;  %621 = vrot.lane.b32.xlu0 %v1922_v48, %s1698_s24  ;;  %532 = vrot.lane.b32.xlu1 %v1922_v48, %s1699_s25  ;;  %v1964_v63 = vadd.f32 %v445_v51, %v335_v62  ;;  %v2068_v15 = vpop.permute.xlu1 %1130 }
  0xfb   : > { %v1988_v3 = vadd.f32 %v447_v52, %v335_v62  ;;  %2677 = vst [vmem:[#allocation19_spill] sm:$0xff] %v2068_v15 }
  0xfe   : > { %711 = vrot.lane.b32.xlu0 %v1922_v48, %s1700_s26  ;;  %1149 = vrot.lane.b32.xlu1 %v1922_v48, %s1701_s10 }
  0xff   : > { %v451_v54 = vpop.f32.mrb[4].mxu0  ;;  %v2078_v16 = vpop.permute.xlu1 %1216 }
 0x100   : > { %v453_v56 = vpop.f32.mrb[5].mxu0  ;;  %v2023_v8 = vadd.f32 %v451_v54, %v1908_v39  ;;  %2678 = vst [vmem:[#allocation20_spill] sm:$0xff] %v2078_v16  ;;  %v557_v54 = vld [vmem:[%s2640_s7] ss:$8 sm:$0x3] }
 0x101   : > { %v1938_v57 = vpop.f32.mrb[6].mxu0  ;;  %v2036_v10 = vadd.f32 %v453_v56, %v1908_v39  ;;  %v560_v39 = vshrl.u32 %v559_v22, 7  ;;  %v2130_v56 = vpop.f32.mrb[0].mxu1 }
 0x102   : > { %801 = vrot.lane.b32.xlu0 %v1922_v48, %s1702_s12  ;;  %516 = vrot.lane.b32.xlu1 %v1936_v55, %s1699_s25  ;;  %v1944_v58 = vpop.f32.mrb[7].mxu0  ;;  %v2066_v14 = vadd.f32 %v1938_v57, %v1912_v41  ;;  %2686 = vst [vmem:[#allocation28_spill] sm:$0xff] %v2130_v56  ;;  %v2136_v62 = vpop.f32.mrb[1].mxu1 }
 0x103   : > { %v2086_v17 = vadd.f32 %v1944_v58, %v1912_v41  ;;  %v2123_v51 = vsub.s32 0, %v560_v39  ;;  %v2125_v52 = vsub.s32 1, %v560_v39  ;;  %2687 = vst [vmem:[#allocation29_spill] sm:$0xff] %v2136_v62 }
 0x104   : > { %2676 = vst [vmem:[#allocation18_spill] sm:$0xff] %v2066_v14  ;;  %v2088_v18 = vpop.permute.xlu1 %1245 }
 0x105   : > { %2679 = vst [vmem:[#allocation21_spill] sm:$0xff] %v2086_v17  ;;  %2680 = vst [vmem:[#allocation22_spill] sm:$0xff] %v2088_v18  ;;  %v2144_v22 = vrot.slane %v557_v54, %v2125_v52  ;;  %v2240_v18 = vrot.slane %v1504_v59, %v2125_v52 }
 0x106   : > { %879 = vrot.lane.b32.xlu0 %v1922_v48, %s1703_s13  ;;  %881 = vrot.lane.b32.xlu1 %v1936_v55, %s1703_s13 }
 0x107   : > { %v2106_v24 = vpop.f32.mrb[8].mxu0 }
 0x108   : > { %v2101_v21 = vpop.permute.xlu1 %1250  ;;  %2681 = vst [vmem:[#allocation23_spill] sm:$0xff] %v2106_v24  ;;  %v2110_v26 = vpop.f32.mrb[9].mxu0 }
 0x109   : > { %2683 = vst [vmem:[#allocation25_spill] sm:$0xff] %v2110_v26  ;;  %v2112_v27 = vpop.f32.mrb[10].mxu0 }
 0x10a   : > { %969 = vrot.lane.b32.xlu0 %v1922_v48, %s1704_s17  ;;  %971 = vrot.lane.b32.xlu1 %v1936_v55, %s1704_s17  ;;  %2684 = vst [vmem:[#allocation26_spill] sm:$0xff] %v2112_v27  ;;  %v2116_v41 = vpop.f32.mrb[11].mxu0 }
 0x10b   : > { %2685 = vst [vmem:[#allocation27_spill] sm:$0xff] %v2116_v41 }
 0x10e   : > { %1059 = vrot.lane.b32.xlu0 %v1922_v48, %s1705_s18  ;;  %1061 = vrot.lane.b32.xlu1 %v1936_v55, %s1705_s18 }
 0x112   : > { %609 = vrot.lane.b32.xlu0 %v1936_v55, %s1698_s24  ;;  %623 = vrot.lane.b32.xlu1 %v1964_v63, %s1698_s24 }
 0x116   : > { %699 = vrot.lane.b32.xlu0 %v1936_v55, %s1700_s26  ;;  %713 = vrot.lane.b32.xlu1 %v1964_v63, %s1700_s26 }
 0x11a   : > { %789 = vrot.lane.b32.xlu0 %v1936_v55, %s1702_s12  ;;  %803 = vrot.lane.b32.xlu1 %v1964_v63, %s1702_s12 }
 0x11e   : > { %1151 = vrot.lane.b32.xlu0 %v1936_v55, %s1701_s10  ;;  %1153 = vrot.lane.b32.xlu1 %v1964_v63, %s1701_s10 }
 0x122   : > { %534 = vrot.lane.b32.xlu0 %v1964_v63, %s1699_s25  ;;  %611 = vrot.lane.b32.xlu1 %v1988_v3, %s1698_s24 }
 0x126   : > { %883 = vrot.lane.b32.xlu0 %v1964_v63, %s1703_s13  ;;  %701 = vrot.lane.b32.xlu1 %v1988_v3, %s1700_s26 }
 0x12a   : > { %973 = vrot.lane.b32.xlu0 %v1964_v63, %s1704_s17  ;;  %791 = vrot.lane.b32.xlu1 %v1988_v3, %s1702_s12 }
 0x12e   : > { %1063 = vrot.lane.b32.xlu0 %v1964_v63, %s1705_s18  ;;  %885 = vrot.lane.b32.xlu1 %v1988_v3, %s1703_s13 }
 0x132   : > { %518 = vrot.lane.b32.xlu0 %v1988_v3, %s1699_s25  ;;  %975 = vrot.lane.b32.xlu1 %v1988_v3, %s1704_s17 }
 0x136   : > { %1155 = vrot.lane.b32.xlu0 %v1988_v3, %s1701_s10  ;;  %1065 = vrot.lane.b32.xlu1 %v1988_v3, %s1705_s18 }
 0x13a   : > { %536 = vrot.lane.b32.xlu0 %v2023_v8, %s1699_s25  ;;  %887 = vrot.lane.b32.xlu1 %v2023_v8, %s1703_s13 }
 0x13e   : > { %625 = vrot.lane.b32.xlu0 %v2023_v8, %s1698_s24  ;;  %977 = vrot.lane.b32.xlu1 %v2023_v8, %s1704_s17 }
 0x142   : > { %715 = vrot.lane.b32.xlu0 %v2023_v8, %s1700_s26  ;;  %520 = vrot.lane.b32.xlu1 %v2036_v10, %s1699_s25 }
 0x146   : > { %805 = vrot.lane.b32.xlu0 %v2023_v8, %s1702_s12  ;;  %613 = vrot.lane.b32.xlu1 %v2036_v10, %s1698_s24 }
 0x14a   : > { %1067 = vrot.lane.b32.xlu0 %v2023_v8, %s1705_s18  ;;  %703 = vrot.lane.b32.xlu1 %v2036_v10, %s1700_s26 }
 0x14e   : > { %1157 = vrot.lane.b32.xlu0 %v2023_v8, %s1701_s10  ;;  %793 = vrot.lane.b32.xlu1 %v2036_v10, %s1702_s12 }
 0x152   : > { %979 = vrot.lane.b32.xlu0 %v2036_v10, %s1704_s17  ;;  %889 = vrot.lane.b32.xlu1 %v2036_v10, %s1703_s13 }
 0x156   : > { %891 = vrot.lane.b32.xlu0 %v2066_v14, %s1703_s13  ;;  %1069 = vrot.lane.b32.xlu1 %v2036_v10, %s1705_s18 }
 0x15a   : > { %1071 = vrot.lane.b32.xlu0 %v2066_v14, %s1705_s18  ;;  %1159 = vrot.lane.b32.xlu1 %v2036_v10, %s1701_s10 }
 0x15e   : > { %1161 = vrot.lane.b32.xlu0 %v2066_v14, %s1701_s10  ;;  %538 = vrot.lane.b32.xlu1 %v2066_v14, %s1699_s25 }
 0x162   : > { %983 = vrot.lane.b32.xlu0 %v2086_v17, %s1704_s17  ;;  %627 = vrot.lane.b32.xlu1 %v2066_v14, %s1698_s24 }
 0x166   : > { %1255 = vperm.xlu0 %1602, %v1241_v20   ;;  %717 = vrot.lane.b32.xlu1 %v2066_v14, %s1700_s26  ;;  %v2141_v20 = vrot.slane %v557_v54, %v2123_v51  ;;  %v505_v54 = vmul.f32 %v1886_v28, %v1936_v55 }
 0x16a   : > { %354 = vperm.xlu0 %1602, %v324_v23   ;;  %807 = vrot.lane.b32.xlu1 %v2066_v14, %s1702_s12  ;;  %v2146_v23 = vpop.f32.mrb[2].mxu1 }
 0x16b   : > { %2688 = vst [vmem:[#allocation30_spill] sm:$0xff] %v2146_v23  ;;  %v2148_v39 = vpop.f32.mrb[3].mxu1 }
 0x16c   : > { %v622_v47 = vpop.permute.xlu0 %621  ;;  %v533_v49 = vpop.permute.xlu1 %532  ;;  %2689 = vst [vmem:[#allocation31_spill] sm:$0xff] %v2148_v39  ;;  %v504_v39 = vmul.f32 %v1886_v28, %v1922_v48 }
 0x16e   : > { %364 = vperm.xlu0 %1602, %v326_v46   ;;  %981 = vrot.lane.b32.xlu1 %v2066_v14, %s1704_s17 }
 0x170   : > { %v2132_v57 = vpop.permute.xlu0 %711  ;;  %v2134_v58 = vpop.permute.xlu1 %1149 }
 0x172   : > { %522 = vrot.lane.b32.xlu1 %v2086_v17, %s1699_s25  ;;  %s1516_s25 = sshll.u32 %s1773_s9, 7  ;;  %s1706_s9 = smov [#allocation2]  }
 0x173   : > { %s2591_s22 = scalar_lea.hbm %s2641_s8, %s1516_s25  ;;  %s1629_s19 = sshll.u32 %s1706_s9, 4  ;;  %s1630_s19 = int_to_ptr.vmem [resolvable:$false] %s1629_s19 }
 0x174   : > { %v2150_v46 = vpop.permute.xlu0 %801  ;;  %v517_v56 = vpop.permute.xlu1 %516  ;;  %s1631_s20 = scalar_lea.vmem %s1630_s19, 256 }
 0x175   : > { %v541_v26 = vsel %vm540_vm2, %v533_v49, %v517_v56  ;;  %v553_v62 = vsel %vm540_vm2, %v517_v56, %v533_v49 }
 0x176   : > { %v569_v24 = vmul.f32 %v2141_v20, %v553_v62  ;;  %v570_v44 = vmul.f32 %v2144_v22, %v541_v26  ;;  %615 = vrot.lane.b32.xlu1 %v2086_v17, %s1698_s24  ;;  %s1490_s24 = sshll.u32 %s296_s21, 3 }
 0x178   : > { %v593_v23 = vmul.f32 %v1920_v45, %v569_v24  ;;  %v594_v15 = vmul.f32 %v1920_v45, %v570_v44  ;;  %v880_v12 = vpop.permute.xlu0 %879  ;;  %v882_v49 = vpop.permute.xlu1 %881  ;;  %v1502_v44 = vld [vmem:[%s2640_s7 + $0x1] ss:$8 sm:$0x3] }
 0x179   : > { %v896_v56 = vsel %vm895_vm3, %v880_v12, %v882_v49  ;;  %v912_v26 = vsel %vm895_vm3, %v882_v49, %v880_v12 }
 0x17a   : > { %v601_v62 = vadd.f32 %v593_v23, %v504_v39  ;;  %v602_v9 = vadd.f32 %v594_v15, %v505_v54  ;;  %705 = vrot.lane.b32.xlu1 %v2086_v17, %s1700_s26  ;;  %v2191_v23 = vrot.slane %v1502_v44, %v2125_v52  ;;  %v1503_v39 = vld [vmem:[%s2640_s7 + $0x2] ss:$8 sm:$0x3]  ;;  %v1505_v54 = vld [vmem:[%s2640_s7 + $0x5] ss:$8 sm:$0x3] }
 0x17b   : > { %v2208_v1 = vrot.slane %v1503_v39, %v2123_v51  ;;  %v2211_v25 = vrot.slane %v1503_v39, %v2125_v52 }
 0x17c   : > { %v970_v55 = vpop.permute.xlu0 %969  ;;  %v972_v6 = vpop.permute.xlu1 %971 }
 0x17d   : > { %v2169_v28 = vsel %vm985_vm4, %v970_v55, %v972_v6  ;;  %v2172_v48 = vsel %vm985_vm4, %v972_v6, %v970_v55  ;;  %v2188_v6 = vrot.slane %v1502_v44, %v2123_v51 }
 0x17e   : > { %795 = vrot.lane.b32.xlu1 %v2086_v17, %s1702_s12 }
 0x180   : > { %v1060_v45 = vpop.permute.xlu0 %1059  ;;  %v1062_v12 = vpop.permute.xlu1 %1061 }
 0x181   : > { %v2180_v15 = vsel %vm1075_vm5, %v1060_v45, %v1062_v12  ;;  %v2183_v24 = vsel %vm1075_vm5, %v1062_v12, %v1060_v45 }
 0x182   : > { %893 = vrot.lane.b32.xlu1 %v2086_v17, %s1703_s13  ;;  %s1413_s13 = scalar_lea.sflag [#allocation3], %s296_s21 }
 0x184   : > { %v610_v49 = vpop.permute.xlu0 %609  ;;  %v2199_v55 = vpop.permute.xlu1 %623 }
 0x185   : > { %v630_v45 = vsel %vm629_vm6, %v622_v47, %v610_v49  ;;  %v642_v12 = vsel %vm629_vm6, %v610_v49, %v622_v47  ;;  %v2217_v47 = vrot.slane %v1505_v54, %v2123_v51  ;;  %v1506_v49 = vld [vmem:[%s2640_s7 + $0x6] ss:$8 sm:$0x3] }
 0x186   : > { %v659_v4 = vmul.f32 %v2188_v6, %v642_v12  ;;  %v660_v44 = vmul.f32 %v2191_v23, %v630_v45  ;;  %1073 = vrot.lane.b32.xlu1 %v2086_v17, %s1705_s18  ;;  %v2223_v45 = vrot.slane %v1505_v54, %v2125_v52  ;;  %v1507_v12 = vld [vmem:[%s2640_s7 + $0x7] ss:$8 sm:$0x3]  ;;  %v2237_v54 = vrot.slane %v1504_v59, %v2123_v51  ;;  %v1242_v59 = vld [vmem:[%s2637_s4 + $0x18] sm:$0xff] }
 0x187   : > { %v2247_v35 = vrot.slane %v1506_v49, %v2123_v51 }
 0x188   : > { %v683_v39 = vmul.f32 %v1924_v50, %v659_v4  ;;  %v684_v14 = vmul.f32 %v1924_v50, %v660_v44  ;;  %v700_v41 = vpop.permute.xlu0 %699  ;;  %v2230_v27 = vpop.permute.xlu1 %713 }
 0x189   : > { %v720_v16 = vsel %vm719_vm7, %v2132_v57, %v700_v41  ;;  %v732_v40 = vsel %vm719_vm7, %v700_v41, %v2132_v57  ;;  %v2250_v41 = vrot.slane %v1506_v49, %v2125_v52  ;;  %v2253_v57 = vrot.slane %v1507_v12, %v2123_v51 }
 0x18a   : > { %v691_v37 = vadd.f32 %v683_v39, %v601_v62  ;;  %v692_v4 = vadd.f32 %v684_v14, %v602_v9  ;;  %v749_v50 = vmul.f32 %v2208_v1, %v732_v40  ;;  %v750_v44 = vmul.f32 %v2211_v25, %v720_v16  ;;  %1163 = vrot.lane.b32.xlu1 %v2086_v17, %s1701_s10  ;;  %s298_s10 = scalar_lea.vmem [#allocation2], %s1490_s24 }
 0x18b   : > { %v2259_v40 = vrot.slane %v1507_v12, %v2125_v52  ;;  %v929_v49 = vmul.f32 %v2217_v47, %v896_v56  ;;  %v930_v39 = vmul.f32 %v2223_v45, %v912_v26  ;;  %v1508_v12 = vld [vmem:[%s2640_s7 + $0x10] ss:$8 sm:$0x3]  ;;  %v1019_v56 = vmul.f32 %v2247_v35, %v2169_v28  ;;  %s1427_s26 = sshll.u32 %s298_s10, 4  ;;  %s2593_s26 = int_to_ptr.vmem [resolvable:$true] %s1427_s26 }
 0x18c   : > { %v773_v9 = vmul.f32 %v1962_v61, %v749_v50  ;;  %v774_v14 = vmul.f32 %v1962_v61, %v750_v44  ;;  %v790_v16 = vpop.permute.xlu0 %789  ;;  %v804_v62 = vpop.permute.xlu1 %803  ;;  %v1020_v26 = vmul.f32 %v2250_v41, %v2172_v48  ;;  %s1625_s23 = scalar_lea.vmem %s2593_s26, 128  ;;  %p1632_p0 = scmp.lt.s32.totalorder %s2593_s26, %s1630_s19 }
 0x18d   : > { %v810_v17 = vsel %vm809_vm8, %v2150_v46, %v790_v16  ;;  %v822_v33 = vsel %vm809_vm8, %v790_v16, %v2150_v46  ;;  %v323_v46 = vld [vmem:[%s2635_s2 + $0x20] sm:$0xff]  ;;  %v953_v28 = vmul.f32 %v2004_v5, %v929_v49  ;;  %v954_v48 = vmul.f32 %v2004_v5, %v930_v39  ;;  %v325_v5 = vld [vmem:[%s2635_s2 + $0x30] sm:$0xff]  ;;  %p1626_p11 = scmp.ne.s32.totalorder %s2593_s26, %s1625_s23  ;;  %p1633_p1 = scmp.lt.s32.totalorder %s1631_s20, %s1625_s23 }
 0x18e   : > { %v781_v50 = vadd.f32 %v773_v9, %v691_v37  ;;  %v782_v31 = vadd.f32 %v774_v14, %v692_v4  ;;  %v839_v61 = vmul.f32 %v2237_v54, %v822_v33  ;;  %v840_v44 = vmul.f32 %v2240_v18, %v810_v17  ;;  %1260 = vperm.xlu1 %1603, %v1242_v59  }
 0x18f   : > { %v2284_v4 = vrot.slane %v1508_v12, %v2123_v51  ;;  %v2287_v33 = vrot.slane %v1508_v12, %v2125_v52  ;;  %v1110_v51 = vmul.f32 %v2259_v40, %v2183_v24  ;;  %v1044_v49 = vmul.f32 %v2020_v7, %v1020_v26  ;;  %p1627_p12 = pnand %p1626_p11, %p1790_p5  ;;  %p1634_p2 = por %p1633_p1, %p1632_p0 }
 0x190   : > { %v863_v16 = vmul.f32 %v1986_v2, %v839_v61  ;;  %v864_v37 = vmul.f32 %v1986_v2, %v840_v44  ;;  %v1152_v17 = vpop.permute.xlu0 %1151  ;;  %v2289_v59 = vpop.permute.xlu1 %1153  ;;  %v1109_v2 = vmul.f32 %v2253_v57, %v2180_v15  ;;  %v1043_v61 = vmul.f32 %v2020_v7, %v1019_v56 }
 0x191   : > { %v1166_v9 = vsel %vm1165_vm9, %v2134_v58, %v1152_v17  ;;  %v1182_v14 = vsel %vm1165_vm9, %v1152_v17, %v2134_v58  ;;  %p1628_p13 = pneg %p1627_p12 }
 0x192   : > { %v871_v52 = vadd.f32 %v863_v16, %v781_v50  ;;  %v872_v12 = vadd.f32 %v864_v37, %v782_v31  ;;  %349 = vperm.xlu1 %1603, %v323_v46   ;;  %v1199_v58 = vmul.f32 %v2284_v4, %v1166_v9  ;;  %v1200_v15 = vmul.f32 %v2287_v33, %v1182_v14  ;;  %v1356_v46 = vld [vmem:[%s2639_s6] sm:$0xf] }
 0x193   : > { %v1133_v7 = vmul.f32 %v2042_v11, %v1109_v2  ;;  %v1134_v50 = vmul.f32 %v2042_v11, %v1110_v51  ;;  %p1635_p3 = pnand %p1634_p2, %p1628_p13 }
 0x194   : > { %v961_v39 = vadd.f32 %v953_v28, %v871_v52  ;;  %v962_v44 = vadd.f32 %v954_v48, %v872_v12  ;;  %v535_v17 = vpop.permute.xlu0 %534  ;;  %v612_v30 = vpop.permute.xlu1 %611  ;;  %v1223_v28 = vmul.f32 %v2058_v13, %v1199_v58  ;;  %v1224_v48 = vmul.f32 %v2058_v13, %v1200_v15 }
 0x195   : > { %v631_v31 = vsel %vm629_vm6, %v2199_v55, %v612_v30  ;;  %v643_v24 = vsel %vm629_vm6, %v612_v30, %v2199_v55 }
 0x196   : > { %v1051_v56 = vadd.f32 %v1043_v61, %v961_v39  ;;  %v1052_v26 = vadd.f32 %v1044_v49, %v962_v44  ;;  %359 = vperm.xlu1 %1603, %v325_v5   ;;  %v661_v44 = vmul.f32 %v2188_v6, %v643_v24  ;;  %v662_v58 = vmul.f32 %v2191_v23, %v631_v31 }
 0x198   : > { %v1141_v16 = vadd.f32 %v1133_v7, %v1051_v56  ;;  %v1142_v37 = vadd.f32 %v1134_v50, %v1052_v26  ;;  %v884_v9 = vpop.permute.xlu0 %883  ;;  %v702_v14 = vpop.permute.xlu1 %701  ;;  %v506_v7 = vmul.f32 %v1916_v43, %v1964_v63  ;;  %v507_v50 = vmul.f32 %v1916_v43, %v1988_v3 }
 0x199   : > { %v721_v30 = vsel %vm719_vm7, %v2230_v27, %v702_v14  ;;  %v733_v11 = vsel %vm719_vm7, %v702_v14, %v2230_v27 }
 0x19a   : > { %v2323_v55 = vadd.f32 %v1223_v28, %v1141_v16  ;;  %v2325_v2 = vadd.f32 %v1224_v48, %v1142_v37  ;;  %1359 = vperm.xlu1 %1603, %v1356_v46   ;;  %v751_v26 = vmul.f32 %v2208_v1, %v733_v11  ;;  %v752_v24 = vmul.f32 %v2211_v25, %v721_v30 }
 0x19b   : > { %v685_v28 = vmul.f32 %v1934_v53, %v661_v44  ;;  %v686_v48 = vmul.f32 %v1934_v53, %v662_v58 }
 0x19c   : > { %v974_v51 = vpop.permute.xlu0 %973  ;;  %v792_v52 = vpop.permute.xlu1 %791 }
 0x19d   : > { %v811_v12 = vsel %vm809_vm8, %v804_v62, %v792_v52  ;;  %v823_v61 = vsel %vm809_vm8, %v792_v52, %v804_v62 }
 0x19e   : > { %v841_v31 = vmul.f32 %v2237_v54, %v823_v61  ;;  %v842_v46 = vmul.f32 %v2240_v18, %v811_v12  ;;  %v775_v12 = vmul.f32 %v1970_v0, %v751_v26 }
 0x1a0   : > { %v1064_v13 = vpop.permute.xlu0 %1063  ;;  %v886_v49 = vpop.permute.xlu1 %885 }
 0x1a1   : > { %v913_v16 = vsel %vm895_vm3, %v886_v49, %v884_v9 }
 0x1a4   : > { %v519_v5 = vpop.permute.xlu0 %518  ;;  %v976_v39 = vpop.permute.xlu1 %975 }
 0x1a5   : > { %v542_v27 = vsel %vm540_vm2, %v535_v17, %v519_v5  ;;  %v554_v15 = vsel %vm540_vm2, %v519_v5, %v535_v17  ;;  %v897_v17 = vsel %vm895_vm3, %v884_v9, %v886_v49  ;;  %v987_v11 = vsel %vm985_vm4, %v974_v51, %v976_v39 }
 0x1a6   : > { %v571_v62 = vmul.f32 %v2141_v20, %v554_v15  ;;  %v572_v56 = vmul.f32 %v2144_v22, %v542_v27  ;;  %v1003_v52 = vsel %vm985_vm4, %v976_v39, %v974_v51  ;;  %v776_v9 = vmul.f32 %v1970_v0, %v752_v24 }
 0x1a7   : > { %v931_v61 = vmul.f32 %v2217_v47, %v897_v17  ;;  %v865_v49 = vmul.f32 %v1894_v32, %v841_v31  ;;  %v866_v5 = vmul.f32 %v1894_v32, %v842_v46  ;;  %v1021_v15 = vmul.f32 %v2247_v35, %v987_v11 }
 0x1a8   : > { %v595_v63 = vmul.f32 %v2090_v19, %v571_v62  ;;  %v596_v43 = vmul.f32 %v2090_v19, %v572_v56  ;;  %v1156_v3 = vpop.permute.xlu0 %1155  ;;  %v1066_v37 = vpop.permute.xlu1 %1065  ;;  %v932_v19 = vmul.f32 %v2223_v45, %v913_v16  ;;  %v1022_v51 = vmul.f32 %v2250_v41, %v1003_v52 }
 0x1a9   : > { %v1077_v39 = vsel %vm1075_vm5, %v1064_v13, %v1066_v37  ;;  %v1093_v0 = vsel %vm1075_vm5, %v1066_v37, %v1064_v13  ;;  %v1167_v62 = vsel %vm1165_vm9, %v2289_v59, %v1156_v3  ;;  %v1183_v32 = vsel %vm1165_vm9, %v1156_v3, %v2289_v59 }
 0x1aa   : > { %v603_v14 = vadd.f32 %v595_v63, %v506_v7  ;;  %v604_v30 = vadd.f32 %v596_v43, %v507_v50  ;;  %v955_v56 = vmul.f32 %v1898_v34, %v931_v61  ;;  %v956_v26 = vmul.f32 %v1898_v34, %v932_v19 }
 0x1ab   : > { %v1111_v46 = vmul.f32 %v2253_v57, %v1077_v39  ;;  %v1112_v17 = vmul.f32 %v2259_v40, %v1093_v0  ;;  %v1201_v63 = vmul.f32 %v2284_v4, %v1167_v62  ;;  %v1202_v43 = vmul.f32 %v2287_v33, %v1183_v32 }
 0x1ac   : > { %v693_v44 = vadd.f32 %v685_v28, %v603_v14  ;;  %v694_v53 = vadd.f32 %v686_v48, %v604_v30  ;;  %v537_v58 = vpop.permute.xlu0 %536  ;;  %v2357_v27 = vpop.permute.xlu1 %887  ;;  %v1045_v59 = vmul.f32 %v1902_v36, %v1021_v15  ;;  %v1046_v3 = vmul.f32 %v1902_v36, %v1022_v51 }
 0x1ad   : > { %v1135_v14 = vmul.f32 %v1906_v38, %v1111_v46  ;;  %v1136_v30 = vmul.f32 %v1906_v38, %v1112_v17  ;;  %v508_v17 = vmul.f32 %v1888_v29, %v2023_v8 }
 0x1ae   : > { %v783_v7 = vadd.f32 %v775_v12, %v693_v44  ;;  %v784_v50 = vadd.f32 %v776_v9, %v694_v53  ;;  %v1225_v12 = vmul.f32 %v1914_v42, %v1201_v63  ;;  %v1226_v9 = vmul.f32 %v1914_v42, %v1202_v43 }
 0x1b0   : > { %v873_v24 = vadd.f32 %v865_v49, %v783_v7  ;;  %v874_v31 = vadd.f32 %v866_v5, %v784_v50  ;;  %v626_v16 = vpop.permute.xlu0 %625  ;;  %v978_v13 = vpop.permute.xlu1 %977 }
 0x1b2   : > { %v963_v37 = vadd.f32 %v955_v56, %v873_v24  ;;  %v964_v28 = vadd.f32 %v956_v26, %v874_v31 }
 0x1b4   : > { %v1053_v48 = vadd.f32 %v1045_v59, %v963_v37  ;;  %v1054_v34 = vadd.f32 %v1046_v3, %v964_v28  ;;  %v716_v11 = vpop.permute.xlu0 %715  ;;  %v521_v52 = vpop.permute.xlu1 %520 }
 0x1b5   : > { %v543_v49 = vsel %vm540_vm2, %v537_v58, %v521_v52  ;;  %v555_v5 = vsel %vm540_vm2, %v521_v52, %v537_v58 }
 0x1b6   : > { %v1143_v61 = vadd.f32 %v1135_v14, %v1053_v48  ;;  %v1144_v19 = vadd.f32 %v1136_v30, %v1054_v34  ;;  %v573_v51 = vmul.f32 %v2141_v20, %v555_v5  ;;  %v574_v38 = vmul.f32 %v2144_v22, %v543_v49  ;;  %v2691_v30 = vld [vmem:[#allocation6_spill] sm:$0xff] }
 0x1b8   : > { %v1233_v44 = vadd.f32 %v1225_v12, %v1143_v61  ;;  %v1234_v36 = vadd.f32 %v1226_v9, %v1144_v19  ;;  %v806_v53 = vpop.permute.xlu0 %805  ;;  %v614_v15 = vpop.permute.xlu1 %613  ;;  %v597_v58 = vmul.f32 %v1952_v60, %v573_v51  ;;  %v598_v32 = vmul.f32 %v1952_v60, %v574_v38  ;;  %v2690_v60 = vld [vmem:[#allocation5_spill] sm:$0xff]  ;;  %v2692_v9 = vld [vmem:[#allocation7_spill] sm:$0xff] }
 0x1b9   : > { %v632_v39 = vsel %vm629_vm6, %v626_v16, %v614_v15  ;;  %v644_v0 = vsel %vm629_vm6, %v614_v15, %v626_v16  ;;  %v509_v16 = vmul.f32 %v1888_v29, %v2036_v10 }
 0x1ba   : > { %v663_v42 = vmul.f32 %v2188_v6, %v644_v0  ;;  %v664_v7 = vmul.f32 %v2191_v23, %v632_v39  ;;  %v2396_v46 = vadd.f32 %v2101_v21, %v1233_v44  ;;  %v2403_v63 = vadd.f32 %v2101_v21, %v1234_v36 }
 0x1bb   : > { %v605_v3 = vadd.f32 %v597_v58, %v508_v17  ;;  %v606_v48 = vadd.f32 %v598_v32, %v509_v16  ;;  %v2694_v17 = vld [vmem:[#allocation9_spill] sm:$0xff] }
 0x1bc   : > { %v2387_v50 = vpop.permute.xlu0 %1067  ;;  %v704_v62 = vpop.permute.xlu1 %703  ;;  %v687_v43 = vmul.f32 %v2690_v60, %v663_v42  ;;  %v688_v37 = vmul.f32 %v2690_v60, %v664_v7  ;;  %v1281_v21 = vmul.f32 0.044715, %v2396_v46  ;;  %v1282_v39 = vmul.f32 0.044715, %v2403_v63 }
 0x1bd   : > { %v722_v56 = vsel %vm719_vm7, %v716_v11, %v704_v62  ;;  %v734_v26 = vsel %vm719_vm7, %v704_v62, %v716_v11 }
 0x1be   : > { %v753_v24 = vmul.f32 %v2208_v1, %v734_v26  ;;  %v754_v31 = vmul.f32 %v2211_v25, %v722_v56  ;;  %v695_v52 = vadd.f32 %v687_v43, %v605_v3  ;;  %v696_v12 = vadd.f32 %v688_v37, %v606_v48  ;;  %v2693_v26 = vld [vmem:[#allocation8_spill] sm:$0xff] }
 0x1c0   : > { %v1158_v28 = vpop.permute.xlu0 %1157  ;;  %v794_v59 = vpop.permute.xlu1 %793  ;;  %v777_v8 = vmul.f32 %v2691_v30, %v753_v24  ;;  %v778_v11 = vmul.f32 %v2691_v30, %v754_v31  ;;  %v1290_v31 = vmul.f32 %v1282_v39, %v2403_v63 }
 0x1c1   : > { %v812_v34 = vsel %vm809_vm8, %v806_v53, %v794_v59  ;;  %v824_v14 = vsel %vm809_vm8, %v794_v59, %v806_v53 }
 0x1c2   : > { %v843_v29 = vmul.f32 %v2237_v54, %v824_v14  ;;  %v844_v10 = vmul.f32 %v2240_v18, %v812_v34  ;;  %v785_v51 = vadd.f32 %v777_v8, %v695_v52  ;;  %v786_v38 = vadd.f32 %v778_v11, %v696_v12 }
 0x1c3   : > { %v1298_v14 = vmul.f32 %v1290_v31, %v2403_v63 }
 0x1c4   : > { %v867_v61 = vmul.f32 %v2692_v9, %v843_v29  ;;  %v868_v19 = vmul.f32 %v2692_v9, %v844_v10  ;;  %v980_v49 = vpop.permute.xlu0 %979  ;;  %v890_v5 = vpop.permute.xlu1 %889 }
 0x1c5   : > { %v988_v44 = vsel %vm985_vm4, %v978_v13, %v980_v49  ;;  %v1004_v36 = vsel %vm985_vm4, %v980_v49, %v978_v13  ;;  %v898_v53 = vsel %vm895_vm3, %v2357_v27, %v890_v5  ;;  %v914_v15 = vsel %vm895_vm3, %v890_v5, %v2357_v27 }
 0x1c6   : > { %v1023_v0 = vmul.f32 %v2247_v35, %v988_v44  ;;  %v1024_v42 = vmul.f32 %v2250_v41, %v1004_v36  ;;  %v933_v7 = vmul.f32 %v2217_v47, %v898_v53  ;;  %v934_v62 = vmul.f32 %v2223_v45, %v914_v15 }
 0x1c7   : > { %v1289_v13 = vmul.f32 %v1281_v21, %v2396_v46  ;;  %v875_v32 = vadd.f32 %v867_v61, %v785_v51  ;;  %v876_v56 = vadd.f32 %v868_v19, %v786_v38  ;;  %v1306_v29 = vadd.f32 %v1298_v14, %v2403_v63 }
 0x1c8   : > { %v1070_v58 = vpop.permute.xlu1 %1069  ;;  %v957_v24 = vmul.f32 %v2693_v26, %v933_v7  ;;  %v958_v27 = vmul.f32 %v2693_v26, %v934_v62  ;;  %v1047_v16 = vmul.f32 %v2694_v17, %v1023_v0  ;;  %v1048_v60 = vmul.f32 %v2694_v17, %v1024_v42  ;;  %v2435_v30 = vpop.permute.xlu0 %891  ;;  %v2695_v0 = vld [vmem:[#allocation22_spill] sm:$0xff]  ;;  %v2697_v26 = vld [vmem:[#allocation20_spill] sm:$0xff] }
 0x1c9   : > { %v1297_v34 = vmul.f32 %v1289_v13, %v2396_v46  ;;  %v1314_v12 = vmul.f32 0.7978846, %v1306_v29  ;;  %v1078_v19 = vsel %vm1075_vm5, %v2387_v50, %v1070_v58  ;;  %v1094_v5 = vsel %vm1075_vm5, %v1070_v58, %v2387_v50  ;;  %v2696_v62 = vld [vmem:[#allocation10_spill] sm:$0xff] }
 0x1ca   : > { %v965_v43 = vadd.f32 %v957_v24, %v875_v32  ;;  %v966_v37 = vadd.f32 %v958_v27, %v876_v56  ;;  %v1113_v36 = vmul.f32 %v2253_v57, %v1078_v19  ;;  %v1114_v15 = vmul.f32 %v2259_v40, %v1094_v5  ;;  %v2698_v5 = vld [vmem:[#allocation26_spill] sm:$0xff] }
 0x1cb   : > { %v1305_v11 = vadd.f32 %v1297_v34, %v2396_v46  ;;  %v2464_v42 = vadd.f32 %v2695_v0, %v2325_v2 }
 0x1cc   : > { %v1160_v59 = vpop.permute.xlu1 %1159  ;;  %v1055_v3 = vadd.f32 %v1047_v16, %v965_v43  ;;  %v1056_v48 = vadd.f32 %v1048_v60, %v966_v37  ;;  %v2441_v21 = vpop.permute.xlu0 %1071  ;;  %v1137_v58 = vmul.f32 %v2696_v62, %v1113_v36  ;;  %v1138_v32 = vmul.f32 %v2696_v62, %v1114_v15 }
 0x1cd   : > { %v1313_v52 = vmul.f32 0.7978846, %v1305_v11  ;;  %v1168_v44 = vsel %vm1165_vm9, %v1158_v28, %v1160_v59  ;;  %v1184_v53 = vsel %vm1165_vm9, %v1160_v59, %v1158_v28  ;;  %v2470_v28 = vadd.f32 %v2695_v0, %v2323_v55 }
 0x1ce   : > { %v1203_v38 = vmul.f32 %v2284_v4, %v1168_v44  ;;  %v1204_v50 = vmul.f32 %v2287_v33, %v1184_v53  ;;  %v1280_v17 = vmul.f32 0.044715, %v2464_v42  ;;  %v1145_v16 = vadd.f32 %v1137_v58, %v1055_v3  ;;  %v2699_v3 = vld [vmem:[#allocation27_spill] sm:$0xff] }
 0x1cf   : > { %1609 = vtanh.f32 %v1313_v52  ;;  %v1146_v43 = vadd.f32 %v1138_v32, %v1056_v48  ;;  %v1273_v59 = vmul.f32 0.5, %v2396_v46  ;;  %v1279_v55 = vmul.f32 0.044715, %v2470_v28 }
 0x1d0   : > { %v539_v8 = vpop.permute.xlu1 %538  ;;  %1611 = vtanh.f32 %v1314_v12  ;;  %v2445_v61 = vpop.permute.xlu0 %1161  ;;  %v1227_v24 = vmul.f32 %v2697_v26, %v1203_v38  ;;  %v1228_v31 = vmul.f32 %v2697_v26, %v1204_v50  ;;  %v1274_v11 = vmul.f32 0.5, %v2403_v63 }
 0x1d1   : > { %v1288_v12 = vmul.f32 %v1280_v17, %v2464_v42  ;;  %v1287_v15 = vmul.f32 %v1279_v55, %v2470_v28  ;;  %v2702_v55 = vld [vmem:[#allocation24_spill] sm:$0xff] }
 0x1d2   : > { %v1235_v34 = vadd.f32 %v1227_v24, %v1145_v16  ;;  %v1236_v29 = vadd.f32 %v1228_v31, %v1146_v43  ;;  %v2701_v43 = vld [vmem:[#allocation12_spill] sm:$0xff] }
 0x1d3   : > { %v1295_v26 = vmul.f32 %v1287_v15, %v2470_v28 }
 0x1d4   : > { %v2439_v10 = vpop.permute.xlu1 %627  ;;  %v2460_v39 = vpop.permute.xlu0 %983 }
 0x1d8   : > { %v2443_v9 = vpop.permute.xlu1 %717 }
 0x1d9   : > { %v1610_v7 = vpop.eup %1609 }
 0x1da   : > { %v1612_v13 = vpop.eup %1611  ;;  %v1329_v2 = vadd.f32 1.0, %v1610_v7  ;;  %v1296_v7 = vmul.f32 %v1288_v12, %v2464_v42 }
 0x1db   : > { %v1330_v60 = vadd.f32 1.0, %v1612_v13 }
 0x1dc   : > { %v2449_v49 = vpop.permute.xlu1 %807  ;;  %v1337_v52 = vmul.f32 %v1329_v2, %v1273_v59 }
 0x1dd   : > { %v1338_v48 = vmul.f32 %v1330_v60, %v1274_v11  ;;  %v2700_v60 = vld [vmem:[#allocation18_spill] sm:$0xff]  ;;  %v2703_v11 = vld [vmem:[#allocation21_spill] sm:$0xff] }
 0x1e0   : > { %v2457_v51 = vpop.permute.xlu1 %981 }
 0x1e4   : > { %v523_v56 = vpop.permute.xlu1 %522 }
 0x1e5   : > { %v1256_v27 = vpop.permute.xlu0 %1255  ;;  %v544_v63 = vsel %vm540_vm2, %v539_v8, %v523_v56  ;;  %v556_v50 = vsel %vm540_vm2, %v523_v56, %v539_v8  ;;  %v1304_v8 = vadd.f32 %v1296_v7, %v2464_v42 }
 0x1e6   : > { %v2480_v19 = vadd.f32 %v1256_v27, %v1235_v34  ;;  %v2484_v53 = vadd.f32 %v1256_v27, %v1236_v29  ;;  %v575_v24 = vmul.f32 %v2141_v20, %v556_v50  ;;  %v576_v27 = vmul.f32 %v2144_v22, %v544_v63 }
 0x1e7   : > { %v510_v20 = vmul.f32 %v2701_v43, %v2700_v60  ;;  %v511_v29 = vmul.f32 %v2701_v43, %v2703_v11  ;;  %v1312_v12 = vmul.f32 0.7978846, %v1304_v8 }
 0x1e8   : > { %v616_v37 = vpop.permute.xlu1 %615  ;;  %v1283_v62 = vmul.f32 0.044715, %v2480_v19  ;;  %v1284_v58 = vmul.f32 0.044715, %v2484_v53  ;;  %v599_v34 = vmul.f32 %v2702_v55, %v575_v24 }
 0x1e9   : > { %v355_v14 = vpop.permute.xlu0 %354  ;;  %v645_v13 = vsel %vm629_vm6, %v616_v37, %v2439_v10  ;;  %v633_v31 = vsel %vm629_vm6, %v2439_v10, %v616_v37  ;;  %v1303_v37 = vadd.f32 %v1295_v26, %v2470_v28  ;;  %1613 = vtanh.f32 %v1312_v12 }
 0x1ea   : > { %v466_v44 = vadd.f32 %v2698_v5, %v355_v14  ;;  %v468_v36 = vadd.f32 %v2699_v3, %v355_v14  ;;  %v1291_v56 = vmul.f32 %v1283_v62, %v2480_v19  ;;  %v665_v2 = vmul.f32 %v2188_v6, %v645_v13  ;;  %v2704_v5 = vld [vmem:[#allocation13_spill] sm:$0xff]  ;;  %v2705_v62 = vld [vmem:[#allocation14_spill] sm:$0xff] }
 0x1eb   : > { %v1292_v22 = vmul.f32 %v1284_v58, %v2484_v53  ;;  %v666_v59 = vmul.f32 %v2191_v23, %v633_v31  ;;  %v600_v6 = vmul.f32 %v2702_v55, %v576_v27  ;;  %v607_v63 = vadd.f32 %v599_v34, %v510_v20  ;;  %v2706_v27 = vld [vmem:[#allocation15_spill] sm:$0xff] }
 0x1ec   : > { %v706_v46 = vpop.permute.xlu1 %705  ;;  %v2487_v38 = vmul.f32 %v1337_v52, %v466_v44  ;;  %v2489_v0 = vmul.f32 %v1338_v48, %v468_v36  ;;  %v689_v44 = vmul.f32 %v2704_v5, %v665_v2  ;;  %v1299_v48 = vmul.f32 %v1291_v56, %v2480_v19 }
 0x1ed   : > { %v723_v17 = vsel %vm719_vm7, %v2443_v9, %v706_v46  ;;  %v735_v16 = vsel %vm719_vm7, %v706_v46, %v2443_v9  ;;  %v608_v50 = vadd.f32 %v600_v6, %v511_v29  ;;  %v1311_v7 = vmul.f32 0.7978846, %v1303_v37  ;;  %v2708_v29 = vld [vmem:[#allocation17_spill] sm:$0xff] }
 0x1ee   : > { %v755_v52 = vmul.f32 %v2208_v1, %v735_v16  ;;  %v756_v23 = vmul.f32 %v2211_v25, %v723_v17  ;;  %v1300_v25 = vmul.f32 %v1292_v22, %v2484_v53  ;;  %v697_v26 = vadd.f32 %v689_v44, %v607_v63  ;;  %v2707_v17 = vld [vmem:[#allocation16_spill] sm:$0xff] }
 0x1ef   : > { %1615 = vtanh.f32 %v1311_v7 }
 0x1f0   : > { %v796_v32 = vpop.permute.xlu1 %795  ;;  %v779_v58 = vmul.f32 %v2705_v62, %v755_v52  ;;  %v780_v13 = vmul.f32 %v2705_v62, %v756_v23  ;;  %v1308_v56 = vadd.f32 %v1300_v25, %v2484_v53 }
 0x1f1   : > { %v813_v14 = vsel %vm809_vm8, %v2449_v49, %v796_v32  ;;  %v825_v9 = vsel %vm809_vm8, %v796_v32, %v2449_v49  ;;  %v690_v49 = vmul.f32 %v2704_v5, %v666_v59  ;;  %v2709_v5 = vld [vmem:[#allocation19_spill] sm:$0xff] }
 0x1f2   : > { %v845_v46 = vmul.f32 %v2237_v54, %v825_v9  ;;  %v846_v15 = vmul.f32 %v2240_v18, %v813_v14  ;;  %v989_v54 = vsel %vm985_vm4, %v2457_v51, %v2460_v39  ;;  %v1307_v18 = vadd.f32 %v1299_v48, %v2480_v19  ;;  %v2710_v48 = vld [vmem:[#allocation11_spill] sm:$0xff] }
 0x1f3   : > { %v698_v24 = vadd.f32 %v690_v49, %v608_v50  ;;  %v1025_v20 = vmul.f32 %v2247_v35, %v989_v54  ;;  %v1316_v55 = vmul.f32 0.7978846, %v1308_v56  ;;  %v1614_v12 = vpop.eup %1613 }
 0x1f4   : > { %v894_v10 = vpop.permute.xlu1 %893  ;;  %v869_v31 = vmul.f32 %v2706_v27, %v845_v46  ;;  %v870_v8 = vmul.f32 %v2706_v27, %v846_v15 }
 0x1f5   : > { %v899_v3 = vsel %vm895_vm3, %v2435_v30, %v894_v10  ;;  %v915_v36 = vsel %vm895_vm3, %v894_v10, %v2435_v30  ;;  %v788_v2 = vadd.f32 %v780_v13, %v698_v24  ;;  %v1315_v10 = vmul.f32 0.7978846, %v1307_v18 }
 0x1f6   : > { %v935_v30 = vmul.f32 %v2217_v47, %v899_v3  ;;  %v936_v32 = vmul.f32 %v2223_v45, %v915_v36  ;;  %v1005_v47 = vsel %vm985_vm4, %v2460_v39, %v2457_v51  ;;  %v787_v45 = vadd.f32 %v779_v58, %v697_v26 }
 0x1f7   : > { %v1026_v37 = vmul.f32 %v2250_v41, %v1005_v47  ;;  %v878_v39 = vadd.f32 %v870_v8, %v788_v2  ;;  %1617 = vtanh.f32 %v1315_v10  ;;  %v1272_v13 = vmul.f32 0.5, %v2464_v42  ;;  %v2711_v47 = vld [vmem:[#allocation23_spill] sm:$0xff]  ;;  %v2712_v2 = vld [vmem:[#allocation25_spill] sm:$0xff] }
 0x1f8   : > { %v1074_v1 = vpop.permute.xlu1 %1073  ;;  %v959_v16 = vmul.f32 %v2707_v17, %v935_v30  ;;  %v960_v60 = vmul.f32 %v2707_v17, %v936_v32  ;;  %v877_v51 = vadd.f32 %v869_v31, %v787_v45  ;;  %1619 = vtanh.f32 %v1316_v55 }
 0x1f9   : > { %v1079_v22 = vsel %vm1075_vm5, %v2441_v21, %v1074_v1  ;;  %v1095_v59 = vsel %vm1075_vm5, %v1074_v1, %v2441_v21  ;;  %v1049_v21 = vmul.f32 %v2708_v29, %v1025_v20  ;;  %v1050_v41 = vmul.f32 %v2708_v29, %v1026_v37 }
 0x1fa   : > { %v967_v14 = vadd.f32 %v959_v16, %v877_v51  ;;  %v968_v35 = vadd.f32 %v960_v60, %v878_v39  ;;  %v1115_v9 = vmul.f32 %v2253_v57, %v1079_v22  ;;  %v1116_v11 = vmul.f32 %v2259_v40, %v1095_v59  ;;  %v1616_v57 = vpop.eup %1615  ;;  %v2713_v39 = vld [vmem:[#allocation28_spill] sm:$0xff] }
 0x1fb   : > { %v1327_v50 = vadd.f32 1.0, %v1616_v57  ;;  %v1271_v30 = vmul.f32 0.5, %v2470_v28  ;;  %v1275_v16 = vmul.f32 0.5, %v2480_v19  ;;  %v1276_v60 = vmul.f32 0.5, %v2484_v53 }
 0x1fc   : > { %v1164_v43 = vpop.permute.xlu1 %1163  ;;  %v1139_v44 = vmul.f32 %v2709_v5, %v1115_v9  ;;  %v1057_v3 = vadd.f32 %v1049_v21, %v967_v14  ;;  %v1058_v36 = vadd.f32 %v1050_v41, %v968_v35  ;;  %v365_v21 = vpop.permute.xlu0 %364 }
 0x1fd   : > { %v1169_v34 = vsel %vm1165_vm9, %v2445_v61, %v1164_v43  ;;  %v1185_v6 = vsel %vm1165_vm9, %v1164_v43, %v2445_v61  ;;  %v1140_v61 = vmul.f32 %v2709_v5, %v1116_v11  ;;  %v1335_v24 = vmul.f32 %v1327_v50, %v1271_v30  ;;  %v2715_v5 = vld [vmem:[#allocation30_spill] sm:$0xff] }
 0x1fe   : > { %v1205_v52 = vmul.f32 %v2284_v4, %v1169_v34  ;;  %v1206_v23 = vmul.f32 %v2287_v33, %v1185_v6  ;;  %v1147_v46 = vadd.f32 %v1139_v44, %v1057_v3  ;;  %v1328_v33 = vadd.f32 1.0, %v1614_v12  ;;  %v2714_v34 = vld [vmem:[#allocation29_spill] sm:$0xff] }
 0x1ff   : > { %v1148_v15 = vadd.f32 %v1140_v61, %v1058_v36  ;;  %v476_v44 = vadd.f32 %v2715_v5, %v365_v21  ;;  %v2716_v61 = vld [vmem:[#allocation31_spill] sm:$0xff] }
 0x200   : > { %v1229_v40 = vmul.f32 %v2710_v48, %v1205_v52  ;;  %v1230_v49 = vmul.f32 %v2710_v48, %v1206_v23  ;;  %v1336_v26 = vmul.f32 %v1328_v33, %v1272_v13  ;;  %v478_v3 = vadd.f32 %v2716_v61, %v365_v21 }
 0x201   : > { %v1618_v4 = vpop.eup %1617 }
 0x202   : > { %v1237_v1 = vadd.f32 %v1229_v40, %v1147_v46  ;;  %v1238_v25 = vadd.f32 %v1230_v49, %v1148_v15  ;;  %v1620_v7 = vpop.eup %1619  ;;  %v1331_v27 = vadd.f32 1.0, %v1618_v4  ;;  %v1351_v46 = vld [vmem:[%s2638_s5] sm:$0x3] }
 0x203   : > { %v1332_v31 = vadd.f32 1.0, %v1620_v7 }
 0x204   : > { %v1339_v22 = vmul.f32 %v1331_v27, %v1275_v16 }
 0x205   : > { %v1340_v59 = vmul.f32 %v1332_v31, %v1276_v60 }
 0x20d   : > { %v1261_v63 = vpop.permute.xlu1 %1260 }
 0x20e   : > { %v1269_v62 = vadd.f32 %v1261_v63, %v1237_v1  ;;  %v1270_v58 = vadd.f32 %v1261_v63, %v1238_v25 }
 0x210   : > { %v1285_v32 = vmul.f32 0.044715, %v1269_v62  ;;  %v1286_v54 = vmul.f32 0.044715, %v1270_v58  ;;  %v1277_v52 = vmul.f32 0.5, %v1269_v62  ;;  %v1278_v23 = vmul.f32 0.5, %v1270_v58 }
 0x211   : > { %v350_v18 = vpop.permute.xlu1 %349 }
 0x212   : > { %v1293_v8 = vmul.f32 %v1285_v32, %v1269_v62  ;;  %v1294_v56 = vmul.f32 %v1286_v54, %v1270_v58  ;;  %v462_v45 = vadd.f32 %v2711_v47, %v350_v18  ;;  %v464_v17 = vadd.f32 %v2712_v2, %v350_v18 }
 0x214   : > { %v1301_v42 = vmul.f32 %v1293_v8, %v1269_v62  ;;  %v1302_v43 = vmul.f32 %v1294_v56, %v1270_v58  ;;  %v1343_v28 = vmul.f32 %v1335_v24, %v462_v45  ;;  %v1344_v20 = vmul.f32 %v1336_v26, %v464_v17 }
 0x215   : > { %v360_v10 = vpop.permute.xlu1 %359 }
 0x216   : > { %v1309_v37 = vadd.f32 %v1301_v42, %v1269_v62  ;;  %v1352_v51 = vpack.c.bf16 %v2487_v38, %v1343_v28  ;;  %v472_v55 = vadd.f32 %v2713_v39, %v360_v10  ;;  %v474_v6 = vadd.f32 %v2714_v34, %v360_v10 }
 0x217   : > { %v1353_v14 = vpack.c.bf16 %v2489_v0, %v1344_v20  ;;  %v1310_v35 = vadd.f32 %v1302_v43, %v1270_v58 }
 0x218   : > { %v1317_v19 = vmul.f32 0.7978846, %v1309_v37  ;;  %v1347_v9 = vmul.f32 %v1339_v22, %v472_v55  ;;  %v1348_v53 = vmul.f32 %v1340_v59, %v474_v6 }
 0x219   : > { %1366 = vmatprep.subr.bf16.mxu1 %v1353_v14  ;;  %v1318_v11 = vmul.f32 0.7978846, %v1310_v35  ;;  %v1360_v15 = vpop.permute.xlu1 %1359 }
 0x21a   : > { %1621 = vtanh.f32 %v1317_v19  ;;  %1367 = vmatpush1.bf16.msra.mxu1 %v1352_v51 }
 0x21b   : > { %1623 = vtanh.f32 %v1318_v11 }
 0x224   : > { %v1622_v29 = vpop.eup %1621 }
 0x225   : > { %v1624_v41 = vpop.eup %1623  ;;  %v1333_v38 = vadd.f32 1.0, %v1622_v29 }
 0x226   : > { %v1334_v12 = vadd.f32 1.0, %v1624_v41 }
 0x227   : > { %v1341_v0 = vmul.f32 %v1333_v38, %v1277_v52 }
 0x228   : > { %v1342_v36 = vmul.f32 %v1334_v12, %v1278_v23 }
 0x229   : > { %v1349_v57 = vmul.f32 %v1341_v0, %v476_v44 }
 0x22a   : > { %v1350_v48 = vmul.f32 %v1342_v36, %v478_v3 }
 0x22b   : > { %v1354_v40 = vpack.c.bf16 %v1349_v57, %v1347_v9 }
 0x22c   : > { %v1355_v49 = vpack.c.bf16 %v1350_v48, %v1348_v53 }
 0x22e   : > { %1368 = vmatprep.subr.bf16.mxu1 %v1355_v49 }
 0x22f   : > { %1369 = vmatpush1.bf16.msra.mxu1 %v1354_v40 }
 0x232   : > { %1509 = vmatmul.mubr.msk.bf16.vlgmr.msra.gmra.mrb[4].mxu1 %vm1362_vm10, %v1351_v46 }
 0x305   : > { %v1400_v1 = vpop.f32.mrb[4].mxu1 }
 0x306   : > { %v1401_v25 = vadd.f32 %v1400_v1, %v1360_v15  ;;  %v1402_v4 = vpop.f32.mrb[5].mxu1 }
 0x307   : > { %v1403_v63 = vadd.f32 %v1402_v4, %v1360_v15  ;;  %v1404_v33 = vpop.f32.mrb[6].mxu1 }
 0x308   : > { %v1405_v50 = vpop.f32.mrb[7].mxu1 }
 0x309   : > { %v1409_v7 = vcombine.low %v1401_v25, %v1403_v63 }
 0x30b   : > { %1411 = vst [vmem:[%s298_s10] sm:$0xff] %v1409_v7 }
 0x30c   : > { %1638 = shalt.err (!%p1635_p3)
}
 0x30d   : > { %s1639_s18 = scalar_lea.hbm %s2591_s22, 128  ;;  %s1643_s25 = scalar_lea.hbm %s2641_s8, 256 }
 0x30e   : > { %p1640_p4 = scmp.ne.s32.totalorder %s2591_s22, %s1639_s18  ;;  %p1644_p9 = scmp.lt.u32.totalorder %s2591_s22, %s2641_s8 }
 0x30f   : > { %p1645_p10 = scmp.lt.u32.totalorder %s1643_s25, %s1639_s18  ;;  %p1647_p12 = scmp.lt.u32.totalorder %s1639_s18, %s2591_s22 }
 0x310   : > { %p1641_p7 = pnand %p1640_p4, %p1790_p5 }
 0x311   : > { %p1646_p11 = por %p1645_p10, %p1644_p9 }
 0x312   : > { %p1642_p8 = pneg %p1641_p7 }
 0x313   : > { %p1648_p13 = por %p1647_p12, %p1646_p11 }
 0x315   : > { %p1649_p0 = pnand %p1648_p13, %p1642_p8 }
 0x317   : > { %1652 = shalt.err (!%p1649_p0)
}
 0x318   : > { %1519 = dma.vmem_to_hbm [thread:$0]  (%p1790_p5), %s2593_s26, 128, %s2591_s22, %s1413_s13  }
 0x319 PF: > { %p1525_p1 = scmp.ge.s32.totalorder %s1687_s30, 2  ;;  %s1439_s17 = sand.u32 1, %s1675_s27  }
 0x31a   : > { %s1440_s23 = scalar_lea.sflag [#allocation3], %s1439_s17 }
 0x31b   : > { %p1522_p2 = pnand %p1525_p1, %p1794_p6 }
 0x31d   : > { %1670 = dma.done.wait (!%p1522_p2), %s1440_s23, 128  }
 0x31e   : > { %1672 = vsyncadd (!%p1522_p2), %s1440_s23, 4294967168  ;;  %p18_p3 = scmp.ge.s32.totalorder %s1777_s11, 4   ;;  %s2717_s27 = smov %s1679_s28 }
 0x31f   : > { %s2718_s28 = smov %s1683_s29  ;;  %s2719_s29 = smov %s1788_s14 }
 0x320   : > { %s2720_s30 = smov %s1777_s11  ;;  %20 = sbr.rel (!%p18_p3) target bundleno = 3 (0x3), region = 94 }
 0x327   :  { %1445 = vsyncpa [#allocation3], 1 }
 0x328   :  { %1447 = vsyncpa [#allocation3 + $0x1], 1 }

</bundles_post_ra>
